<compile_context>
chip_gen: v7x
topology: tpu7x:2x2x1
jax: 0.10.0
libtpu: 0.0.40
codegen_flags: <defaults>
</compile_context>

<pallas_src>
import functools

import jax
import jax.numpy as jnp
from jax import lax
from jax.experimental import pallas as pl
from jax.experimental.pallas import tpu as pltpu


def _round_up(x, m):
    return (x + m - 1) // m * m


def _pick_time_chunk(T, bb, hp, budget_bytes=4 << 20, max_unroll=16):
    """Largest divisor of T whose double-buffered gates_x chunk fits a small
    VMEM budget (keeps v7x's 64 MiB / 32 MiB-scoped limit comfortable)."""
    per_step = bb * 4 * hp * 4          # f32 bytes of gates_x per timestep
    cap = max(1, budget_bytes // (2 * per_step))
    cap = min(cap, max_unroll)          # keep the unrolled inner loop sane
    best = 1
    for d in range(1, T + 1):
        if T % d == 0 and d <= cap:
            best = d
    return best


def _num_batch_blocks(bp):
    # Split batch across the 2 TensorCores (v7x megacore) when it divides
    # cleanly into sublane-aligned halves; harmless single block otherwise.
    if bp >= 16 and bp % 16 == 0:
        return 2
    return 1


def _lstm_kernel(gx_ref, whh_ref, h0_ref, c0_ref,
                 y_ref, hout_ref, cout_ref, *, tc, hp):
    """One grid step = one batch block x one time chunk of Tc steps.

    gx_ref:   (Tc, Bb, 4Hp) f32   precomputed x@W_ih^T + bias
    whh_ref:  (Hp, 4Hp)     bf16  recurrent weights (VMEM-resident)
    h0/c0:    (Bb, Hp)      f32
    y_ref:    (Tc, Bb, Hp)
    hout/cout:(Bb, Hp)      f32   carry (constant block index over time)
    """
    t_chunk = pl.program_id(1)

    @pl.when(t_chunk == 0)
    def _():
        hout_ref[...] = h0_ref[...]
        cout_ref[...] = c0_ref[...]

    whh = whh_ref[...]  # hoist the resident weight load out of the time loop

    def step(i, carry):
        h, c = carry
        # Recurrent matmul: bf16 inputs, f32 accumulation on the MXU.
        gates = gx_ref[i] + jnp.dot(h.astype(jnp.bfloat16), whh,
                                    preferred_element_type=jnp.float32)
        # PyTorch gate order [i, f, g, o]; slices are 128-aligned (hp % 128 == 0).
        i_g = jax.nn.sigmoid(gates[:, 0 * hp:1 * hp])
        f_g = jax.nn.sigmoid(gates[:, 1 * hp:2 * hp])
        g_g = jnp.tanh(gates[:, 2 * hp:3 * hp])
        o_g = jax.nn.sigmoid(gates[:, 3 * hp:4 * hp])
        c_new = f_g * c + i_g * g_g
        h_new = o_g * jnp.tanh(c_new)
        y_ref[i] = h_new.astype(y_ref.dtype)
        return h_new, c_new

    h, c = lax.fori_loop(0, tc, step, (hout_ref[...], cout_ref[...]),
                         unroll=True)
    hout_ref[...] = h
    cout_ref[...] = c


@jax.jit
def lstm_layer_forward(x, w_ih, w_hh, b_ih, b_hh, h0, c0):
    """x: (T, B, D); w_ih: (4H, D); w_hh: (4H, H); biases: (4H,); h0/c0: (B, H).
    Returns y (T, B, H) and final (h, c) each (B, H) (SqueezeStateRNN semantics)."""
    T, B, D = x.shape
    H = h0.shape[-1]
    Hp = _round_up(H, 128)   # lane alignment for gate slices / stores
    Bp = _round_up(B, 8)     # sublane alignment

    # ---- per-gate zero-padding so [i|f|g|o] boundaries stay 128-aligned ----
    def pad_gate_rows(w):  # (4H, K) -> (4Hp, K)
        K = w.shape[1]
        return jnp.pad(w.reshape(4, H, K),
                       ((0, 0), (0, Hp - H), (0, 0))).reshape(4 * Hp, K)

    w_ih_p = pad_gate_rows(w_ih)                                   # (4Hp, D)
    w_hh_p = jnp.pad(pad_gate_rows(w_hh), ((0, 0), (0, Hp - H)))   # (4Hp, Hp)
    bias_p = jnp.pad((b_ih + b_hh).reshape(4, H),
                     ((0, 0), (0, Hp - H))).reshape(4 * Hp)        # (4Hp,)

    w_ih_t = jnp.transpose(w_ih_p).astype(jnp.bfloat16)            # (D, 4Hp)
    w_hh_t = jnp.transpose(w_hh_p).astype(jnp.bfloat16)            # (Hp, 4Hp)

    x_p = jnp.pad(x, ((0, 0), (0, Bp - B), (0, 0)))
    h0_p = jnp.pad(h0.astype(jnp.float32), ((0, Bp - B), (0, Hp - H)))
    c0_p = jnp.pad(c0.astype(jnp.float32), ((0, Bp - B), (0, Hp - H)))

    # ---- hoisted input projection: ONE large bf16 matmul, f32 accumulate ----
    gates_x = (jnp.einsum('tbd,dg->tbg', x_p.astype(jnp.bfloat16), w_ih_t,
                          preferred_element_type=jnp.float32)
               + bias_p.astype(jnp.float32))                        # (T, Bp, 4Hp)

    NB = _num_batch_blocks(Bp)
    Bb = Bp // NB
    Tc = _pick_time_chunk(T, Bb, Hp)
    NT = T // Tc

    kernel = functools.partial(_lstm_kernel, tc=Tc, hp=Hp)

    # TODO(synk): for very large H on v7x, single-buffer the resident W_hh^T
    # (pipeline_mode=pl.Buffered(1) or a one-time copy from pl.ANY) to halve
    # its VMEM footprint; unnecessary at these sizes.
    grid_spec = pltpu.PrefetchScalarGridSpec(
        num_scalar_prefetch=0,
        grid=(NB, NT),
        in_specs=[
            pl.BlockSpec((Tc, Bb, 4 * Hp), lambda b, t: (t, b, 0)),  # gates_x chunk
            pl.BlockSpec((Hp, 4 * Hp), lambda b, t: (0, 0)),         # W_hh^T (resident)
            pl.BlockSpec((Bb, Hp), lambda b, t: (b, 0)),             # h0
            pl.BlockSpec((Bb, Hp), lambda b, t: (b, 0)),             # c0
        ],
        out_specs=(
            pl.BlockSpec((Tc, Bb, Hp), lambda b, t: (t, b, 0)),      # y chunk
            pl.BlockSpec((Bb, Hp), lambda b, t: (b, 0)),             # h_n (carry)
            pl.BlockSpec((Bb, Hp), lambda b, t: (b, 0)),             # c_n (carry)
        ),
    )

    y_p, h_n_p, c_n_p = pl.pallas_call(
        kernel,
        out_shape=(
            jax.ShapeDtypeStruct((T, Bp, Hp), x.dtype),
            jax.ShapeDtypeStruct((Bp, Hp), jnp.float32),
            jax.ShapeDtypeStruct((Bp, Hp), jnp.float32),
        ),
        grid_spec=grid_spec,
        compiler_params=pltpu.CompilerParams(
            # batch blocks are independent (megacore); time recurrence is serial
            dimension_semantics=("parallel", "arbitrary"),
        ),
    )(gates_x, w_hh_t, h0_p, c0_p)

    y = y_p[:, :B, :H]
    h_n = h_n_p[:B, :H]
    c_n = c_n_p[:B, :H]
    return y, (h_n, c_n)


def _lstm_reference_bf16(x, w_ih, w_hh, b_ih, b_hh, h0, c0):
    """Pure-JAX reference matching the kernel's numerics (bf16 matmul inputs,
    f32 accumulation and gate math). Gate order [i, f, g, o]."""
    H = h0.shape[-1]
    b = (b_ih + b_hh).astype(jnp.float32)
    w_ih_bf = w_ih.astype(jnp.bfloat16)
    w_hh_bf = w_hh.astype(jnp.bfloat16)
    gx = jnp.einsum('tbd,gd->tbg', x.astype(jnp.bfloat16), w_ih_bf,
                    preferred_element_type=jnp.float32) + b

    def step(carry, gx_t):
        h, c = carry
        gates = gx_t + jnp.dot(h.astype(jnp.bfloat16), w_hh_bf.T,
                               preferred_element_type=jnp.float32)
        i = jax.nn.sigmoid(gates[:, 0 * H:1 * H])
        f = jax.nn.sigmoid(gates[:, 1 * H:2 * H])
        g = jnp.tanh(gates[:, 2 * H:3 * H])
        o = jax.nn.sigmoid(gates[:, 3 * H:4 * H])
        c_new = f * c + i * g
        h_new = o * jnp.tanh(c_new)
        return (h_new, c_new), h_new

    (h_n, c_n), ys = lax.scan(step, (h0, c0), gx)
    return ys, (h_n, c_n)


def _lstm_reference_f32(x, w_ih, w_hh, b_ih, b_hh, h0, c0):
    """Full-f32 reference matching torch.nn.LSTM semantics."""
    H = h0.shape[-1]
    b = b_ih + b_hh

    def step(carry, x_t):
        h, c = carry
        gates = x_t @ w_ih.T + h @ w_hh.T + b
        i = jax.nn.sigmoid(gates[:, 0 * H:1 * H])
        f = jax.nn.sigmoid(gates[:, 1 * H:2 * H])
        g = jnp.tanh(gates[:, 2 * H:3 * H])
        o = jax.nn.sigmoid(gates[:, 3 * H:4 * H])
        c_new = f * c + i * g
        h_new = o * jnp.tanh(c_new)
        return (h_new, c_new), h_new

    (h_n, c_n), ys = lax.scan(step, (h0, c0), x)
    return ys, (h_n, c_n)


def init_lstm_params(key, input_size, hidden_size, forget_bias_value=2.0):
    """torch.nn.LSTM-style init (U(-k, k), k = 1/sqrt(H)), then set the
    forget-gate quarter of both biases to `forget_bias_value`, exactly as
    LSTMLayer._set_forget_gate_bias does."""
    k = 1.0 / jnp.sqrt(hidden_size)
    k1, k2, k3, k4 = jax.random.split(key, 4)
    w_ih = jax.random.uniform(k1, (4 * hidden_size, input_size), jnp.float32, -k, k)
    w_hh = jax.random.uniform(k2, (4 * hidden_size, hidden_size), jnp.float32, -k, k)
    b_ih = jax.random.uniform(k3, (4 * hidden_size,), jnp.float32, -k, k)
    b_hh = jax.random.uniform(k4, (4 * hidden_size,), jnp.float32, -k, k)
    b_ih = b_ih.at[hidden_size:2 * hidden_size].set(forget_bias_value)
    b_hh = b_hh.at[hidden_size:2 * hidden_size].set(forget_bias_value)
    return w_ih, w_hh, b_ih, b_hh


if __name__ == "__main__":
    T, B, D, H = 8, 4, 16, 32

    key = jax.random.PRNGKey(0)
    kx, kp = jax.random.split(key)
    x = jax.random.normal(kx, (T, B, D), jnp.float32)
    w_ih, w_hh, b_ih, b_hh = init_lstm_params(kp, D, H)

    # hx=None -> zero initial states (squeezed to (B, H) by SqueezeStateRNN)
    h0 = jnp.zeros((B, H), jnp.float32)
    c0 = jnp.zeros((B, H), jnp.float32)

    y, (h_n, c_n) = lstm_layer_forward(x, w_ih, w_hh, b_ih, b_hh, h0, c0)
    jax.block_until_ready((y, h_n, c_n))

    # Main correctness check vs. a reference with identical bf16/f32 numerics.
    y_ref, (h_ref, c_ref) = _lstm_reference_bf16(x, w_ih, w_hh, b_ih, b_hh, h0, c0)
    assert jnp.allclose(y, y_ref, atol=1e-3, rtol=1e-3)
    assert jnp.allclose(h_n, h_ref, atol=1e-3, rtol=1e-3)
    assert jnp.allclose(c_n, c_ref, atol=1e-3, rtol=1e-3)

    # Sanity check vs. full-f32 semantics (loose tolerance: bf16 matmul inputs).
    y32, (h32, c32) = _lstm_reference_f32(x, w_ih, w_hh, b_ih, b_hh, h0, c0)
    assert jnp.max(jnp.abs(y - y32)) < 0.1
    assert jnp.max(jnp.abs(c_n - c32)) < 0.1

    print("KERNEL_OK")
</pallas_src>

<mosaic_0001>
module attributes {stable_mosaic.version = 11 : i64} {
  func.func @_lstm_kernel(%arg0: i32, %arg1: i32, %arg2: memref<8x8x512xf32, #tpu.memory_space<vmem>>, %arg3: memref<128x512xbf16, #tpu.memory_space<vmem>>, %arg4: memref<8x128xf32, #tpu.memory_space<vmem>>, %arg5: memref<8x128xf32, #tpu.memory_space<vmem>>, %arg6: memref<8x8x128xf32, #tpu.memory_space<vmem>>, %arg7: memref<8x128xf32, #tpu.memory_space<vmem>>, %arg8: memref<8x128xf32, #tpu.memory_space<vmem>>) attributes {dimension_semantics = [#tpu.dimension_semantics<parallel>, #tpu.dimension_semantics<arbitrary>], iteration_bounds = array<i64: 1, 1>, scalar_prefetch = 0 : i64, scratch_operands = 0 : i64, tpu.core_type = #tpu.core_type<tc>, window_params = [{transform_indices = @transform_0, window_bounds = array<i64: 8, 8, 512>}, {pipeline_mode = #tpu.pipeline_mode<synchronous>, transform_indices = @transform_1, window_bounds = array<i64: 128, 512>}, {transform_indices = @transform_2, window_bounds = array<i64: 8, 128>}, {transform_indices = @transform_3, window_bounds = array<i64: 8, 128>}, {transform_indices = @transform_4, window_bounds = array<i64: 8, 8, 128>}, {transform_indices = @transform_5, window_bounds = array<i64: 8, 128>}, {transform_indices = @transform_6, window_bounds = array<i64: 8, 128>}]} {
    %c0_i32 = arith.constant 0 : i32
    %0 = arith.cmpi eq, %arg1, %c0_i32 : i32
    %1 = arith.extui %0 : i1 to i32
    %c0_i32_0 = arith.constant 0 : i32
    %2 = arith.cmpi ne, %1, %c0_i32_0 : i32
    scf.if %2 {
      %c0_74 = arith.constant 0 : index
      %c0_75 = arith.constant 0 : index
      %288 = vector.load %arg4[%c0_74, %c0_75] : memref<8x128xf32, #tpu.memory_space<vmem>>, vector<8x128xf32>
      %c0_76 = arith.constant 0 : index
      %c0_77 = arith.constant 0 : index
      %289 = vector.load %arg7[%c0_76, %c0_77] : memref<8x128xf32, #tpu.memory_space<vmem>>, vector<8x128xf32>
      tpu.vector_store %arg7[%c0_76, %c0_77], %288 {strides = array<i32>} : memref<8x128xf32, #tpu.memory_space<vmem>>, vector<8x128xf32>,
      %c0_78 = arith.constant 0 : index
      %c0_79 = arith.constant 0 : index
      %290 = vector.load %arg5[%c0_78, %c0_79] : memref<8x128xf32, #tpu.memory_space<vmem>>, vector<8x128xf32>
      %c0_80 = arith.constant 0 : index
      %c0_81 = arith.constant 0 : index
      %291 = vector.load %arg8[%c0_80, %c0_81] : memref<8x128xf32, #tpu.memory_space<vmem>>, vector<8x128xf32>
      tpu.vector_store %arg8[%c0_80, %c0_81], %290 {strides = array<i32>} : memref<8x128xf32, #tpu.memory_space<vmem>>, vector<8x128xf32>,
    } else {
    }
    %c0 = arith.constant 0 : index
    %c0_1 = arith.constant 0 : index
    %3 = vector.load %arg3[%c0, %c0_1] : memref<128x512xbf16, #tpu.memory_space<vmem>>, vector<128x512xbf16>
    %c0_2 = arith.constant 0 : index
    %c0_3 = arith.constant 0 : index
    %4 = vector.load %arg7[%c0_2, %c0_3] : memref<8x128xf32, #tpu.memory_space<vmem>>, vector<8x128xf32>
    %c0_4 = arith.constant 0 : index
    %c0_5 = arith.constant 0 : index
    %5 = vector.load %arg8[%c0_4, %c0_5] : memref<8x128xf32, #tpu.memory_space<vmem>>, vector<8x128xf32>
    %c0_i32_6 = arith.constant 0 : i32
    %6 = arith.index_cast %c0_i32_6 : i32 to index
    %c0_7 = arith.constant 0 : index
    %c0_8 = arith.constant 0 : index
    %7 = vector.load %arg2[%6, %c0_7, %c0_8] : memref<8x8x512xf32, #tpu.memory_space<vmem>>, vector<1x8x512xf32>
    %8 = vector.shape_cast %7 : vector<1x8x512xf32> to vector<8x512xf32>
    %9 = arith.truncf %4 : vector<8x128xf32> to vector<8x128xbf16>
    %cst = arith.constant dense<0.000000e+00> : vector<8x512xf32>
    %10 = tpu.matmul %9, %3, %cst {dimension_numbers = #tpu.dot_dimension_numbers<[1], [0], [0], [1], [0, 0, 1, 1], [], []>} : vector<8x128xbf16>, vector<128x512xbf16>, vector<8x512xf32> -> vector<8x512xf32>
    %11 = arith.addf %8, %10 : vector<8x512xf32>
    %12 = vector.extract_strided_slice %11 {offsets = [0, 0], sizes = [8, 128], strides = [1, 1]} : vector<8x512xf32> to vector<8x128xf32>
    %13 = arith.negf %12 : vector<8x128xf32>
    %14 = math.exp %13 : vector<8x128xf32>
    %cst_9 = arith.constant 1.000000e+00 : f32
    %15 = vector.broadcast %cst_9 : f32 to vector<8x128xf32>
    %16 = arith.addf %15, %14 : vector<8x128xf32>
    %17 = arith.divf %15, %16 : vector<8x128xf32>
    %18 = vector.extract_strided_slice %11 {offsets = [0, 128], sizes = [8, 128], strides = [1, 1]} : vector<8x512xf32> to vector<8x128xf32>
    %19 = arith.negf %18 : vector<8x128xf32>
    %20 = math.exp %19 : vector<8x128xf32>
    %cst_10 = arith.constant 1.000000e+00 : f32
    %21 = vector.broadcast %cst_10 : f32 to vector<8x128xf32>
    %22 = arith.addf %21, %20 : vector<8x128xf32>
    %23 = arith.divf %21, %22 : vector<8x128xf32>
    %24 = vector.extract_strided_slice %11 {offsets = [0, 256], sizes = [8, 128], strides = [1, 1]} : vector<8x512xf32> to vector<8x128xf32>
    %25 = math.tanh %24 : vector<8x128xf32>
    %26 = vector.extract_strided_slice %11 {offsets = [0, 384], sizes = [8, 128], strides = [1, 1]} : vector<8x512xf32> to vector<8x128xf32>
    %27 = arith.negf %26 : vector<8x128xf32>
    %28 = math.exp %27 : vector<8x128xf32>
    %cst_11 = arith.constant 1.000000e+00 : f32
    %29 = vector.broadcast %cst_11 : f32 to vector<8x128xf32>
    %30 = arith.addf %29, %28 : vector<8x128xf32>
    %31 = arith.divf %29, %30 : vector<8x128xf32>
    %32 = arith.mulf %23, %5 : vector<8x128xf32>
    %33 = arith.mulf %17, %25 : vector<8x128xf32>
    %34 = arith.addf %32, %33 : vector<8x128xf32>
    %35 = math.tanh %34 : vector<8x128xf32>
    %36 = arith.mulf %31, %35 : vector<8x128xf32>
    %37 = arith.index_cast %c0_i32_6 : i32 to index
    %c0_12 = arith.constant 0 : index
    %c0_13 = arith.constant 0 : index
    %38 = vector.load %arg6[%37, %c0_12, %c0_13] : memref<8x8x128xf32, #tpu.memory_space<vmem>>, vector<1x8x128xf32>
    %39 = vector.shape_cast %38 : vector<1x8x128xf32> to vector<8x128xf32>
    %40 = vector.shape_cast %36 : vector<8x128xf32> to vector<1x8x128xf32>
    tpu.vector_store %arg6[%37, %c0_12, %c0_13], %40 {strides = array<i32>} : memref<8x8x128xf32, #tpu.memory_space<vmem>>, vector<1x8x128xf32>,
    %c1_i32 = arith.constant 1 : i32
    %41 = arith.index_cast %c1_i32 : i32 to index
    %c0_14 = arith.constant 0 : index
    %c0_15 = arith.constant 0 : index
    %42 = vector.load %arg2[%41, %c0_14, %c0_15] : memref<8x8x512xf32, #tpu.memory_space<vmem>>, vector<1x8x512xf32>
    %43 = vector.shape_cast %42 : vector<1x8x512xf32> to vector<8x512xf32>
    %44 = arith.truncf %36 : vector<8x128xf32> to vector<8x128xbf16>
    %cst_16 = arith.constant dense<0.000000e+00> : vector<8x512xf32>
    %45 = tpu.matmul %44, %3, %cst_16 {dimension_numbers = #tpu.dot_dimension_numbers<[1], [0], [0], [1], [0, 0, 1, 1], [], []>} : vector<8x128xbf16>, vector<128x512xbf16>, vector<8x512xf32> -> vector<8x512xf32>
    %46 = arith.addf %43, %45 : vector<8x512xf32>
    %47 = vector.extract_strided_slice %46 {offsets = [0, 0], sizes = [8, 128], strides = [1, 1]} : vector<8x512xf32> to vector<8x128xf32>
    %48 = arith.negf %47 : vector<8x128xf32>
    %49 = math.exp %48 : vector<8x128xf32>
    %cst_17 = arith.constant 1.000000e+00 : f32
    %50 = vector.broadcast %cst_17 : f32 to vector<8x128xf32>
    %51 = arith.addf %50, %49 : vector<8x128xf32>
    %52 = arith.divf %50, %51 : vector<8x128xf32>
    %53 = vector.extract_strided_slice %46 {offsets = [0, 128], sizes = [8, 128], strides = [1, 1]} : vector<8x512xf32> to vector<8x128xf32>
    %54 = arith.negf %53 : vector<8x128xf32>
    %55 = math.exp %54 : vector<8x128xf32>
    %cst_18 = arith.constant 1.000000e+00 : f32
    %56 = vector.broadcast %cst_18 : f32 to vector<8x128xf32>
    %57 = arith.addf %56, %55 : vector<8x128xf32>
    %58 = arith.divf %56, %57 : vector<8x128xf32>
    %59 = vector.extract_strided_slice %46 {offsets = [0, 256], sizes = [8, 128], strides = [1, 1]} : vector<8x512xf32> to vector<8x128xf32>
    %60 = math.tanh %59 : vector<8x128xf32>
    %61 = vector.extract_strided_slice %46 {offsets = [0, 384], sizes = [8, 128], strides = [1, 1]} : vector<8x512xf32> to vector<8x128xf32>
    %62 = arith.negf %61 : vector<8x128xf32>
    %63 = math.exp %62 : vector<8x128xf32>
    %cst_19 = arith.constant 1.000000e+00 : f32
    %64 = vector.broadcast %cst_19 : f32 to vector<8x128xf32>
    %65 = arith.addf %64, %63 : vector<8x128xf32>
    %66 = arith.divf %64, %65 : vector<8x128xf32>
    %67 = arith.mulf %58, %34 : vector<8x128xf32>
    %68 = arith.mulf %52, %60 : vector<8x128xf32>
    %69 = arith.addf %67, %68 : vector<8x128xf32>
    %70 = math.tanh %69 : vector<8x128xf32>
    %71 = arith.mulf %66, %70 : vector<8x128xf32>
    %72 = arith.index_cast %c1_i32 : i32 to index
    %c0_20 = arith.constant 0 : index
    %c0_21 = arith.constant 0 : index
    %73 = vector.load %arg6[%72, %c0_20, %c0_21] : memref<8x8x128xf32, #tpu.memory_space<vmem>>, vector<1x8x128xf32>
    %74 = vector.shape_cast %73 : vector<1x8x128xf32> to vector<8x128xf32>
    %75 = vector.shape_cast %71 : vector<8x128xf32> to vector<1x8x128xf32>
    tpu.vector_store %arg6[%72, %c0_20, %c0_21], %75 {strides = array<i32>} : memref<8x8x128xf32, #tpu.memory_space<vmem>>, vector<1x8x128xf32>,
    %c2_i32 = arith.constant 2 : i32
    %76 = arith.index_cast %c2_i32 : i32 to index
    %c0_22 = arith.constant 0 : index
    %c0_23 = arith.constant 0 : index
    %77 = vector.load %arg2[%76, %c0_22, %c0_23] : memref<8x8x512xf32, #tpu.memory_space<vmem>>, vector<1x8x512xf32>
    %78 = vector.shape_cast %77 : vector<1x8x512xf32> to vector<8x512xf32>
    %79 = arith.truncf %71 : vector<8x128xf32> to vector<8x128xbf16>
    %cst_24 = arith.constant dense<0.000000e+00> : vector<8x512xf32>
    %80 = tpu.matmul %79, %3, %cst_24 {dimension_numbers = #tpu.dot_dimension_numbers<[1], [0], [0], [1], [0, 0, 1, 1], [], []>} : vector<8x128xbf16>, vector<128x512xbf16>, vector<8x512xf32> -> vector<8x512xf32>
    %81 = arith.addf %78, %80 : vector<8x512xf32>
    %82 = vector.extract_strided_slice %81 {offsets = [0, 0], sizes = [8, 128], strides = [1, 1]} : vector<8x512xf32> to vector<8x128xf32>
    %83 = arith.negf %82 : vector<8x128xf32>
    %84 = math.exp %83 : vector<8x128xf32>
    %cst_25 = arith.constant 1.000000e+00 : f32
    %85 = vector.broadcast %cst_25 : f32 to vector<8x128xf32>
    %86 = arith.addf %85, %84 : vector<8x128xf32>
    %87 = arith.divf %85, %86 : vector<8x128xf32>
    %88 = vector.extract_strided_slice %81 {offsets = [0, 128], sizes = [8, 128], strides = [1, 1]} : vector<8x512xf32> to vector<8x128xf32>
    %89 = arith.negf %88 : vector<8x128xf32>
    %90 = math.exp %89 : vector<8x128xf32>
    %cst_26 = arith.constant 1.000000e+00 : f32
    %91 = vector.broadcast %cst_26 : f32 to vector<8x128xf32>
    %92 = arith.addf %91, %90 : vector<8x128xf32>
    %93 = arith.divf %91, %92 : vector<8x128xf32>
    %94 = vector.extract_strided_slice %81 {offsets = [0, 256], sizes = [8, 128], strides = [1, 1]} : vector<8x512xf32> to vector<8x128xf32>
    %95 = math.tanh %94 : vector<8x128xf32>
    %96 = vector.extract_strided_slice %81 {offsets = [0, 384], sizes = [8, 128], strides = [1, 1]} : vector<8x512xf32> to vector<8x128xf32>
    %97 = arith.negf %96 : vector<8x128xf32>
    %98 = math.exp %97 : vector<8x128xf32>
    %cst_27 = arith.constant 1.000000e+00 : f32
    %99 = vector.broadcast %cst_27 : f32 to vector<8x128xf32>
    %100 = arith.addf %99, %98 : vector<8x128xf32>
    %101 = arith.divf %99, %100 : vector<8x128xf32>
    %102 = arith.mulf %93, %69 : vector<8x128xf32>
    %103 = arith.mulf %87, %95 : vector<8x128xf32>
    %104 = arith.addf %102, %103 : vector<8x128xf32>
    %105 = math.tanh %104 : vector<8x128xf32>
    %106 = arith.mulf %101, %105 : vector<8x128xf32>
    %107 = arith.index_cast %c2_i32 : i32 to index
    %c0_28 = arith.constant 0 : index
    %c0_29 = arith.constant 0 : index
    %108 = vector.load %arg6[%107, %c0_28, %c0_29] : memref<8x8x128xf32, #tpu.memory_space<vmem>>, vector<1x8x128xf32>
    %109 = vector.shape_cast %108 : vector<1x8x128xf32> to vector<8x128xf32>
    %110 = vector.shape_cast %106 : vector<8x128xf32> to vector<1x8x128xf32>
    tpu.vector_store %arg6[%107, %c0_28, %c0_29], %110 {strides = array<i32>} : memref<8x8x128xf32, #tpu.memory_space<vmem>>, vector<1x8x128xf32>,
    %c3_i32 = arith.constant 3 : i32
    %111 = arith.index_cast %c3_i32 : i32 to index
    %c0_30 = arith.constant 0 : index
    %c0_31 = arith.constant 0 : index
    %112 = vector.load %arg2[%111, %c0_30, %c0_31] : memref<8x8x512xf32, #tpu.memory_space<vmem>>, vector<1x8x512xf32>
    %113 = vector.shape_cast %112 : vector<1x8x512xf32> to vector<8x512xf32>
    %114 = arith.truncf %106 : vector<8x128xf32> to vector<8x128xbf16>
    %cst_32 = arith.constant dense<0.000000e+00> : vector<8x512xf32>
    %115 = tpu.matmul %114, %3, %cst_32 {dimension_numbers = #tpu.dot_dimension_numbers<[1], [0], [0], [1], [0, 0, 1, 1], [], []>} : vector<8x128xbf16>, vector<128x512xbf16>, vector<8x512xf32> -> vector<8x512xf32>
    %116 = arith.addf %113, %115 : vector<8x512xf32>
    %117 = vector.extract_strided_slice %116 {offsets = [0, 0], sizes = [8, 128], strides = [1, 1]} : vector<8x512xf32> to vector<8x128xf32>
    %118 = arith.negf %117 : vector<8x128xf32>
    %119 = math.exp %118 : vector<8x128xf32>
    %cst_33 = arith.constant 1.000000e+00 : f32
    %120 = vector.broadcast %cst_33 : f32 to vector<8x128xf32>
    %121 = arith.addf %120, %119 : vector<8x128xf32>
    %122 = arith.divf %120, %121 : vector<8x128xf32>
    %123 = vector.extract_strided_slice %116 {offsets = [0, 128], sizes = [8, 128], strides = [1, 1]} : vector<8x512xf32> to vector<8x128xf32>
    %124 = arith.negf %123 : vector<8x128xf32>
    %125 = math.exp %124 : vector<8x128xf32>
    %cst_34 = arith.constant 1.000000e+00 : f32
    %126 = vector.broadcast %cst_34 : f32 to vector<8x128xf32>
    %127 = arith.addf %126, %125 : vector<8x128xf32>
    %128 = arith.divf %126, %127 : vector<8x128xf32>
    %129 = vector.extract_strided_slice %116 {offsets = [0, 256], sizes = [8, 128], strides = [1, 1]} : vector<8x512xf32> to vector<8x128xf32>
    %130 = math.tanh %129 : vector<8x128xf32>
    %131 = vector.extract_strided_slice %116 {offsets = [0, 384], sizes = [8, 128], strides = [1, 1]} : vector<8x512xf32> to vector<8x128xf32>
    %132 = arith.negf %131 : vector<8x128xf32>
    %133 = math.exp %132 : vector<8x128xf32>
    %cst_35 = arith.constant 1.000000e+00 : f32
    %134 = vector.broadcast %cst_35 : f32 to vector<8x128xf32>
    %135 = arith.addf %134, %133 : vector<8x128xf32>
    %136 = arith.divf %134, %135 : vector<8x128xf32>
    %137 = arith.mulf %128, %104 : vector<8x128xf32>
    %138 = arith.mulf %122, %130 : vector<8x128xf32>
    %139 = arith.addf %137, %138 : vector<8x128xf32>
    %140 = math.tanh %139 : vector<8x128xf32>
    %141 = arith.mulf %136, %140 : vector<8x128xf32>
    %142 = arith.index_cast %c3_i32 : i32 to index
    %c0_36 = arith.constant 0 : index
    %c0_37 = arith.constant 0 : index
    %143 = vector.load %arg6[%142, %c0_36, %c0_37] : memref<8x8x128xf32, #tpu.memory_space<vmem>>, vector<1x8x128xf32>
    %144 = vector.shape_cast %143 : vector<1x8x128xf32> to vector<8x128xf32>
    %145 = vector.shape_cast %141 : vector<8x128xf32> to vector<1x8x128xf32>
    tpu.vector_store %arg6[%142, %c0_36, %c0_37], %145 {strides = array<i32>} : memref<8x8x128xf32, #tpu.memory_space<vmem>>, vector<1x8x128xf32>,
    %c4_i32 = arith.constant 4 : i32
    %146 = arith.index_cast %c4_i32 : i32 to index
    %c0_38 = arith.constant 0 : index
    %c0_39 = arith.constant 0 : index
    %147 = vector.load %arg2[%146, %c0_38, %c0_39] : memref<8x8x512xf32, #tpu.memory_space<vmem>>, vector<1x8x512xf32>
    %148 = vector.shape_cast %147 : vector<1x8x512xf32> to vector<8x512xf32>
    %149 = arith.truncf %141 : vector<8x128xf32> to vector<8x128xbf16>
    %cst_40 = arith.constant dense<0.000000e+00> : vector<8x512xf32>
    %150 = tpu.matmul %149, %3, %cst_40 {dimension_numbers = #tpu.dot_dimension_numbers<[1], [0], [0], [1], [0, 0, 1, 1], [], []>} : vector<8x128xbf16>, vector<128x512xbf16>, vector<8x512xf32> -> vector<8x512xf32>
    %151 = arith.addf %148, %150 : vector<8x512xf32>
    %152 = vector.extract_strided_slice %151 {offsets = [0, 0], sizes = [8, 128], strides = [1, 1]} : vector<8x512xf32> to vector<8x128xf32>
    %153 = arith.negf %152 : vector<8x128xf32>
    %154 = math.exp %153 : vector<8x128xf32>
    %cst_41 = arith.constant 1.000000e+00 : f32
    %155 = vector.broadcast %cst_41 : f32 to vector<8x128xf32>
    %156 = arith.addf %155, %154 : vector<8x128xf32>
    %157 = arith.divf %155, %156 : vector<8x128xf32>
    %158 = vector.extract_strided_slice %151 {offsets = [0, 128], sizes = [8, 128], strides = [1, 1]} : vector<8x512xf32> to vector<8x128xf32>
    %159 = arith.negf %158 : vector<8x128xf32>
    %160 = math.exp %159 : vector<8x128xf32>
    %cst_42 = arith.constant 1.000000e+00 : f32
    %161 = vector.broadcast %cst_42 : f32 to vector<8x128xf32>
    %162 = arith.addf %161, %160 : vector<8x128xf32>
    %163 = arith.divf %161, %162 : vector<8x128xf32>
    %164 = vector.extract_strided_slice %151 {offsets = [0, 256], sizes = [8, 128], strides = [1, 1]} : vector<8x512xf32> to vector<8x128xf32>
    %165 = math.tanh %164 : vector<8x128xf32>
    %166 = vector.extract_strided_slice %151 {offsets = [0, 384], sizes = [8, 128], strides = [1, 1]} : vector<8x512xf32> to vector<8x128xf32>
    %167 = arith.negf %166 : vector<8x128xf32>
    %168 = math.exp %167 : vector<8x128xf32>
    %cst_43 = arith.constant 1.000000e+00 : f32
    %169 = vector.broadcast %cst_43 : f32 to vector<8x128xf32>
    %170 = arith.addf %169, %168 : vector<8x128xf32>
    %171 = arith.divf %169, %170 : vector<8x128xf32>
    %172 = arith.mulf %163, %139 : vector<8x128xf32>
    %173 = arith.mulf %157, %165 : vector<8x128xf32>
    %174 = arith.addf %172, %173 : vector<8x128xf32>
    %175 = math.tanh %174 : vector<8x128xf32>
    %176 = arith.mulf %171, %175 : vector<8x128xf32>
    %177 = arith.index_cast %c4_i32 : i32 to index
    %c0_44 = arith.constant 0 : index
    %c0_45 = arith.constant 0 : index
    %178 = vector.load %arg6[%177, %c0_44, %c0_45] : memref<8x8x128xf32, #tpu.memory_space<vmem>>, vector<1x8x128xf32>
    %179 = vector.shape_cast %178 : vector<1x8x128xf32> to vector<8x128xf32>
    %180 = vector.shape_cast %176 : vector<8x128xf32> to vector<1x8x128xf32>
    tpu.vector_store %arg6[%177, %c0_44, %c0_45], %180 {strides = array<i32>} : memref<8x8x128xf32, #tpu.memory_space<vmem>>, vector<1x8x128xf32>,
    %c5_i32 = arith.constant 5 : i32
    %181 = arith.index_cast %c5_i32 : i32 to index
    %c0_46 = arith.constant 0 : index
    %c0_47 = arith.constant 0 : index
    %182 = vector.load %arg2[%181, %c0_46, %c0_47] : memref<8x8x512xf32, #tpu.memory_space<vmem>>, vector<1x8x512xf32>
    %183 = vector.shape_cast %182 : vector<1x8x512xf32> to vector<8x512xf32>
    %184 = arith.truncf %176 : vector<8x128xf32> to vector<8x128xbf16>
    %cst_48 = arith.constant dense<0.000000e+00> : vector<8x512xf32>
    %185 = tpu.matmul %184, %3, %cst_48 {dimension_numbers = #tpu.dot_dimension_numbers<[1], [0], [0], [1], [0, 0, 1, 1], [], []>} : vector<8x128xbf16>, vector<128x512xbf16>, vector<8x512xf32> -> vector<8x512xf32>
    %186 = arith.addf %183, %185 : vector<8x512xf32>
    %187 = vector.extract_strided_slice %186 {offsets = [0, 0], sizes = [8, 128], strides = [1, 1]} : vector<8x512xf32> to vector<8x128xf32>
    %188 = arith.negf %187 : vector<8x128xf32>
    %189 = math.exp %188 : vector<8x128xf32>
    %cst_49 = arith.constant 1.000000e+00 : f32
    %190 = vector.broadcast %cst_49 : f32 to vector<8x128xf32>
    %191 = arith.addf %190, %189 : vector<8x128xf32>
    %192 = arith.divf %190, %191 : vector<8x128xf32>
    %193 = vector.extract_strided_slice %186 {offsets = [0, 128], sizes = [8, 128], strides = [1, 1]} : vector<8x512xf32> to vector<8x128xf32>
    %194 = arith.negf %193 : vector<8x128xf32>
    %195 = math.exp %194 : vector<8x128xf32>
    %cst_50 = arith.constant 1.000000e+00 : f32
    %196 = vector.broadcast %cst_50 : f32 to vector<8x128xf32>
    %197 = arith.addf %196, %195 : vector<8x128xf32>
    %198 = arith.divf %196, %197 : vector<8x128xf32>
    %199 = vector.extract_strided_slice %186 {offsets = [0, 256], sizes = [8, 128], strides = [1, 1]} : vector<8x512xf32> to vector<8x128xf32>
    %200 = math.tanh %199 : vector<8x128xf32>
    %201 = vector.extract_strided_slice %186 {offsets = [0, 384], sizes = [8, 128], strides = [1, 1]} : vector<8x512xf32> to vector<8x128xf32>
    %202 = arith.negf %201 : vector<8x128xf32>
    %203 = math.exp %202 : vector<8x128xf32>
    %cst_51 = arith.constant 1.000000e+00 : f32
    %204 = vector.broadcast %cst_51 : f32 to vector<8x128xf32>
    %205 = arith.addf %204, %203 : vector<8x128xf32>
    %206 = arith.divf %204, %205 : vector<8x128xf32>
    %207 = arith.mulf %198, %174 : vector<8x128xf32>
    %208 = arith.mulf %192, %200 : vector<8x128xf32>
    %209 = arith.addf %207, %208 : vector<8x128xf32>
    %210 = math.tanh %209 : vector<8x128xf32>
    %211 = arith.mulf %206, %210 : vector<8x128xf32>
    %212 = arith.index_cast %c5_i32 : i32 to index
    %c0_52 = arith.constant 0 : index
    %c0_53 = arith.constant 0 : index
    %213 = vector.load %arg6[%212, %c0_52, %c0_53] : memref<8x8x128xf32, #tpu.memory_space<vmem>>, vector<1x8x128xf32>
    %214 = vector.shape_cast %213 : vector<1x8x128xf32> to vector<8x128xf32>
    %215 = vector.shape_cast %211 : vector<8x128xf32> to vector<1x8x128xf32>
    tpu.vector_store %arg6[%212, %c0_52, %c0_53], %215 {strides = array<i32>} : memref<8x8x128xf32, #tpu.memory_space<vmem>>, vector<1x8x128xf32>,
    %c6_i32 = arith.constant 6 : i32
    %216 = arith.index_cast %c6_i32 : i32 to index
    %c0_54 = arith.constant 0 : index
    %c0_55 = arith.constant 0 : index
    %217 = vector.load %arg2[%216, %c0_54, %c0_55] : memref<8x8x512xf32, #tpu.memory_space<vmem>>, vector<1x8x512xf32>
    %218 = vector.shape_cast %217 : vector<1x8x512xf32> to vector<8x512xf32>
    %219 = arith.truncf %211 : vector<8x128xf32> to vector<8x128xbf16>
    %cst_56 = arith.constant dense<0.000000e+00> : vector<8x512xf32>
    %220 = tpu.matmul %219, %3, %cst_56 {dimension_numbers = #tpu.dot_dimension_numbers<[1], [0], [0], [1], [0, 0, 1, 1], [], []>} : vector<8x128xbf16>, vector<128x512xbf16>, vector<8x512xf32> -> vector<8x512xf32>
    %221 = arith.addf %218, %220 : vector<8x512xf32>
    %222 = vector.extract_strided_slice %221 {offsets = [0, 0], sizes = [8, 128], strides = [1, 1]} : vector<8x512xf32> to vector<8x128xf32>
    %223 = arith.negf %222 : vector<8x128xf32>
    %224 = math.exp %223 : vector<8x128xf32>
    %cst_57 = arith.constant 1.000000e+00 : f32
    %225 = vector.broadcast %cst_57 : f32 to vector<8x128xf32>
    %226 = arith.addf %225, %224 : vector<8x128xf32>
    %227 = arith.divf %225, %226 : vector<8x128xf32>
    %228 = vector.extract_strided_slice %221 {offsets = [0, 128], sizes = [8, 128], strides = [1, 1]} : vector<8x512xf32> to vector<8x128xf32>
    %229 = arith.negf %228 : vector<8x128xf32>
    %230 = math.exp %229 : vector<8x128xf32>
    %cst_58 = arith.constant 1.000000e+00 : f32
    %231 = vector.broadcast %cst_58 : f32 to vector<8x128xf32>
    %232 = arith.addf %231, %230 : vector<8x128xf32>
    %233 = arith.divf %231, %232 : vector<8x128xf32>
    %234 = vector.extract_strided_slice %221 {offsets = [0, 256], sizes = [8, 128], strides = [1, 1]} : vector<8x512xf32> to vector<8x128xf32>
    %235 = math.tanh %234 : vector<8x128xf32>
    %236 = vector.extract_strided_slice %221 {offsets = [0, 384], sizes = [8, 128], strides = [1, 1]} : vector<8x512xf32> to vector<8x128xf32>
    %237 = arith.negf %236 : vector<8x128xf32>
    %238 = math.exp %237 : vector<8x128xf32>
    %cst_59 = arith.constant 1.000000e+00 : f32
    %239 = vector.broadcast %cst_59 : f32 to vector<8x128xf32>
    %240 = arith.addf %239, %238 : vector<8x128xf32>
    %241 = arith.divf %239, %240 : vector<8x128xf32>
    %242 = arith.mulf %233, %209 : vector<8x128xf32>
    %243 = arith.mulf %227, %235 : vector<8x128xf32>
    %244 = arith.addf %242, %243 : vector<8x128xf32>
    %245 = math.tanh %244 : vector<8x128xf32>
    %246 = arith.mulf %241, %245 : vector<8x128xf32>
    %247 = arith.index_cast %c6_i32 : i32 to index
    %c0_60 = arith.constant 0 : index
    %c0_61 = arith.constant 0 : index
    %248 = vector.load %arg6[%247, %c0_60, %c0_61] : memref<8x8x128xf32, #tpu.memory_space<vmem>>, vector<1x8x128xf32>
    %249 = vector.shape_cast %248 : vector<1x8x128xf32> to vector<8x128xf32>
    %250 = vector.shape_cast %246 : vector<8x128xf32> to vector<1x8x128xf32>
    tpu.vector_store %arg6[%247, %c0_60, %c0_61], %250 {strides = array<i32>} : memref<8x8x128xf32, #tpu.memory_space<vmem>>, vector<1x8x128xf32>,
    %c7_i32 = arith.constant 7 : i32
    %251 = arith.index_cast %c7_i32 : i32 to index
    %c0_62 = arith.constant 0 : index
    %c0_63 = arith.constant 0 : index
    %252 = vector.load %arg2[%251, %c0_62, %c0_63] : memref<8x8x512xf32, #tpu.memory_space<vmem>>, vector<1x8x512xf32>
    %253 = vector.shape_cast %252 : vector<1x8x512xf32> to vector<8x512xf32>
    %254 = arith.truncf %246 : vector<8x128xf32> to vector<8x128xbf16>
    %cst_64 = arith.constant dense<0.000000e+00> : vector<8x512xf32>
    %255 = tpu.matmul %254, %3, %cst_64 {dimension_numbers = #tpu.dot_dimension_numbers<[1], [0], [0], [1], [0, 0, 1, 1], [], []>} : vector<8x128xbf16>, vector<128x512xbf16>, vector<8x512xf32> -> vector<8x512xf32>
    %256 = arith.addf %253, %255 : vector<8x512xf32>
    %257 = vector.extract_strided_slice %256 {offsets = [0, 0], sizes = [8, 128], strides = [1, 1]} : vector<8x512xf32> to vector<8x128xf32>
    %258 = arith.negf %257 : vector<8x128xf32>
    %259 = math.exp %258 : vector<8x128xf32>
    %cst_65 = arith.constant 1.000000e+00 : f32
    %260 = vector.broadcast %cst_65 : f32 to vector<8x128xf32>
    %261 = arith.addf %260, %259 : vector<8x128xf32>
    %262 = arith.divf %260, %261 : vector<8x128xf32>
    %263 = vector.extract_strided_slice %256 {offsets = [0, 128], sizes = [8, 128], strides = [1, 1]} : vector<8x512xf32> to vector<8x128xf32>
    %264 = arith.negf %263 : vector<8x128xf32>
    %265 = math.exp %264 : vector<8x128xf32>
    %cst_66 = arith.constant 1.000000e+00 : f32
    %266 = vector.broadcast %cst_66 : f32 to vector<8x128xf32>
    %267 = arith.addf %266, %265 : vector<8x128xf32>
    %268 = arith.divf %266, %267 : vector<8x128xf32>
    %269 = vector.extract_strided_slice %256 {offsets = [0, 256], sizes = [8, 128], strides = [1, 1]} : vector<8x512xf32> to vector<8x128xf32>
    %270 = math.tanh %269 : vector<8x128xf32>
    %271 = vector.extract_strided_slice %256 {offsets = [0, 384], sizes = [8, 128], strides = [1, 1]} : vector<8x512xf32> to vector<8x128xf32>
    %272 = arith.negf %271 : vector<8x128xf32>
    %273 = math.exp %272 : vector<8x128xf32>
    %cst_67 = arith.constant 1.000000e+00 : f32
    %274 = vector.broadcast %cst_67 : f32 to vector<8x128xf32>
    %275 = arith.addf %274, %273 : vector<8x128xf32>
    %276 = arith.divf %274, %275 : vector<8x128xf32>
    %277 = arith.mulf %268, %244 : vector<8x128xf32>
    %278 = arith.mulf %262, %270 : vector<8x128xf32>
    %279 = arith.addf %277, %278 : vector<8x128xf32>
    %280 = math.tanh %279 : vector<8x128xf32>
    %281 = arith.mulf %276, %280 : vector<8x128xf32>
    %282 = arith.index_cast %c7_i32 : i32 to index
    %c0_68 = arith.constant 0 : index
    %c0_69 = arith.constant 0 : index
    %283 = vector.load %arg6[%282, %c0_68, %c0_69] : memref<8x8x128xf32, #tpu.memory_space<vmem>>, vector<1x8x128xf32>
    %284 = vector.shape_cast %283 : vector<1x8x128xf32> to vector<8x128xf32>
    %285 = vector.shape_cast %281 : vector<8x128xf32> to vector<1x8x128xf32>
    tpu.vector_store %arg6[%282, %c0_68, %c0_69], %285 {strides = array<i32>} : memref<8x8x128xf32, #tpu.memory_space<vmem>>, vector<1x8x128xf32>,
    %c8_i32 = arith.constant 8 : i32
    %c0_70 = arith.constant 0 : index
    %c0_71 = arith.constant 0 : index
    %286 = vector.load %arg7[%c0_70, %c0_71] : memref<8x128xf32, #tpu.memory_space<vmem>>, vector<8x128xf32>
    tpu.vector_store %arg7[%c0_70, %c0_71], %281 {strides = array<i32>} : memref<8x128xf32, #tpu.memory_space<vmem>>, vector<8x128xf32>,
    %c0_72 = arith.constant 0 : index
    %c0_73 = arith.constant 0 : index
    %287 = vector.load %arg8[%c0_72, %c0_73] : memref<8x128xf32, #tpu.memory_space<vmem>>, vector<8x128xf32>
    tpu.vector_store %arg8[%c0_72, %c0_73], %279 {strides = array<i32>} : memref<8x128xf32, #tpu.memory_space<vmem>>, vector<8x128xf32>,
    return
  }
  func.func @transform_0(%arg0: i32, %arg1: i32) -> (i32, i32, i32) {
    %c0_i32 = arith.constant 0 : i32
    %c0_i32_0 = arith.constant 0 : i32
    return %arg1, %arg0, %c0_i32 : i32, i32, i32
  }
  func.func @transform_1(%arg0: i32, %arg1: i32) -> (i32, i32) {
    %c0_i32 = arith.constant 0 : i32
    %c0_i32_0 = arith.constant 0 : i32
    %c0_i32_1 = arith.constant 0 : i32
    return %c0_i32, %c0_i32_0 : i32, i32
  }
  func.func @transform_2(%arg0: i32, %arg1: i32) -> (i32, i32) {
    %c0_i32 = arith.constant 0 : i32
    %c0_i32_0 = arith.constant 0 : i32
    return %arg0, %c0_i32 : i32, i32
  }
  func.func @transform_3(%arg0: i32, %arg1: i32) -> (i32, i32) {
    %c0_i32 = arith.constant 0 : i32
    %c0_i32_0 = arith.constant 0 : i32
    return %arg0, %c0_i32 : i32, i32
  }
  func.func @transform_4(%arg0: i32, %arg1: i32) -> (i32, i32, i32) {
    %c0_i32 = arith.constant 0 : i32
    %c0_i32_0 = arith.constant 0 : i32
    return %arg1, %arg0, %c0_i32 : i32, i32, i32
  }
  func.func @transform_5(%arg0: i32, %arg1: i32) -> (i32, i32) {
    %c0_i32 = arith.constant 0 : i32
    %c0_i32_0 = arith.constant 0 : i32
    return %arg0, %c0_i32 : i32, i32
  }
  func.func @transform_6(%arg0: i32, %arg1: i32) -> (i32, i32) {
    %c0_i32 = arith.constant 0 : i32
    %c0_i32_0 = arith.constant 0 : i32
    return %arg0, %c0_i32 : i32, i32
  }
}

</mosaic_0001>

<bundles_post_ra>
// kernel: lstm_layer_forward.1
= control target key start
LH: loop header
LB: loop body
LE: loop exit
PB: predicated region body
PF: predicated region fallthrough
CT: control target
= control target key end

     0   :  { %v1479_v1 = vmov 0   ;;  %s2167_s1 = inlined_call_operand.vmem [shape: bf16[128,512], index: 1, kind: input, shape index: {}]   ;;  %s2168_s2 = inlined_call_operand.vmem [shape: f32[8,128], index: 2, kind: input, shape index: {}]   ;;  %s2169_s0 = inlined_call_operand.vmem [shape: f32[8,8,512], index: 0, kind: input, shape index: {}]   ;;  %s2170_s3 = inlined_call_operand.vmem [shape: f32[8,128], index: 3, kind: input, shape index: {}]   ;;  %s2171_s4 = inlined_call_operand.vmem [shape: f32[8,8,128], index: 4, kind: output, shape index: {0}]   ;;  %s2172_s6 = inlined_call_operand.vmem [shape: f32[8,128], index: 6, kind: output, shape index: {2}]   ;;  %s2173_s5 = inlined_call_operand.vmem [shape: f32[8,128], index: 5, kind: output, shape index: {1}]  }
   0x1   :  { %v1518_v0 = vld [vmem:[%s2167_s1 + $0x4] ss:$16 sps:$4 sm:$0xff]   ;;  %260 = vmatprep.mubr.bf16.mxu0 %v1479_v1  ;;  %301 = vmatprep.mubr.bf16.mxu1 %v1479_v1  ;;  %v1525_v2 = vld [vmem:[%s2167_s1] ss:$16 sps:$4 sm:$0xff]   ;;  %v1548_v6 = vld [vmem:[%s2167_s1 + $0xc] ss:$16 sps:$4 sm:$0xff]  }
   0x2   :  { %228 = vmatprep.subr.bf16.mxu0 %v1518_v0  ;;  %v1531_v3 = vld [vmem:[%s2167_s1 + $0x24] ss:$16 sps:$4 sm:$0xff]   ;;  %v1537_v4 = vld [vmem:[%s2167_s1 + $0x20] ss:$16 sps:$4 sm:$0xff]   ;;  %v1553_v7 = vld [vmem:[%s2167_s1 + $0x8] ss:$16 sps:$4 sm:$0xff]   ;;  %269 = vmatprep.subr.bf16.mxu1 %v1548_v6 }
   0x3   :  { %229 = vmatpush1.bf16.msra.mxu0 %v1525_v2  ;;  %v1543_v5 = vld [vmem:[%s2167_s1 + $0x44] ss:$16 sps:$4 sm:$0xff]   ;;  %v1559_v8 = vld [vmem:[%s2167_s1 + $0x40] ss:$16 sps:$4 sm:$0xff]   ;;  %270 = vmatpush1.bf16.msra.mxu1 %v1553_v7  ;;  %v1572_v10 = vld [vmem:[%s2167_s1 + $0x2c] ss:$16 sps:$4 sm:$0xff]  }
   0x4   :  { %230 = vmatprep.subr.bf16.mxu0 %v1531_v3  ;;  %v1566_v9 = vld [vmem:[%s2167_s1 + $0x64] ss:$16 sps:$4 sm:$0xff]   ;;  %v1577_v11 = vld [vmem:[%s2167_s1 + $0x28] ss:$16 sps:$4 sm:$0xff]   ;;  %271 = vmatprep.subr.bf16.mxu1 %v1572_v10  ;;  %v1584_v12 = vld [vmem:[%s2167_s1 + $0x60] ss:$16 sps:$4 sm:$0xff]  }
   0x5   :  { %v1589_v13 = vld [vmem:[%s2167_s1 + $0x84] ss:$16 sps:$4 sm:$0xff]   ;;  %v1594_v14 = vld [vmem:[%s2167_s1 + $0x4c] ss:$16 sps:$4 sm:$0xff]   ;;  %v1601_v15 = vld [vmem:[%s2167_s1 + $0x48] ss:$16 sps:$4 sm:$0xff]  }
   0x6   :  { %v1607_v16 = vld [vmem:[%s2167_s1 + $0x6c] ss:$16 sps:$4 sm:$0xff]   ;;  %v1613_v17 = vld [vmem:[%s2167_s1 + $0x80] ss:$16 sps:$4 sm:$0xff]   ;;  %v1619_v18 = vld [vmem:[%s2167_s1 + $0xa4] ss:$16 sps:$4 sm:$0xff]  }
   0x7   :  { %231 = vmatpush1.bf16.msra.mxu0 %v1537_v4  ;;  %272 = vmatpush1.bf16.msra.mxu1 %v1577_v11  ;;  %v1625_v19 = vld [vmem:[%s2167_s1 + $0x68] ss:$16 sps:$4 sm:$0xff]   ;;  %v1631_v20 = vld [vmem:[%s2167_s1 + $0x8c] ss:$16 sps:$4 sm:$0xff]   ;;  %v1636_v21 = vld [vmem:[%s2167_s1 + $0xa0] ss:$16 sps:$4 sm:$0xff]  }
   0x8   :  { %232 = vmatprep.subr.bf16.mxu0 %v1543_v5  ;;  %273 = vmatprep.subr.bf16.mxu1 %v1594_v14  ;;  %v1642_v22 = vld [vmem:[%s2167_s1 + $0xc4] ss:$16 sps:$4 sm:$0xff]   ;;  %v1649_v23 = vld [vmem:[%s2167_s1 + $0x88] ss:$16 sps:$4 sm:$0xff]   ;;  %v1655_v24 = vld [vmem:[%s2167_s1 + $0xac] ss:$16 sps:$4 sm:$0xff]  }
   0x9   :  { %v1661_v25 = vld [vmem:[%s2167_s1 + $0xc0] ss:$16 sps:$4 sm:$0xff]   ;;  %v1667_v26 = vld [vmem:[%s2167_s1 + $0xe4] ss:$16 sps:$4 sm:$0xff]   ;;  %v1673_v27 = vld [vmem:[%s2167_s1 + $0xa8] ss:$16 sps:$4 sm:$0xff]  }
   0xa   :  { %v1679_v28 = vld [vmem:[%s2167_s1 + $0xcc] ss:$16 sps:$4 sm:$0xff]   ;;  %v1685_v29 = vld [vmem:[%s2167_s1 + $0xe0] ss:$16 sps:$4 sm:$0xff]   ;;  %v1695_v31 = vld [vmem:[%s2167_s1 + $0xc8] ss:$16 sps:$4 sm:$0xff]  }
   0xb   :  { %233 = vmatpush1.bf16.msra.mxu0 %v1559_v8  ;;  %274 = vmatpush1.bf16.msra.mxu1 %v1601_v15  ;;  %v25_v30 = vld [vmem:[%s2168_s2] sm:$0xff]  ;;  %v1701_v32 = vld [vmem:[%s2167_s1 + $0xec] ss:$16 sps:$4 sm:$0xff]   ;;  %v1708_v34 = vld [vmem:[%s2167_s1 + $0xe8] ss:$16 sps:$4 sm:$0xff]  }
   0xc   :  { %234 = vmatprep.subr.bf16.mxu0 %v1566_v9  ;;  %275 = vmatprep.subr.bf16.mxu1 %v1607_v16  ;;  %v67_v33 = vpack.c.bf16 %v25_v30, %v25_v30  ;;  %v63_v35 = vld [vmem:[%s2169_s0] sm:$0xff]  ;;  %v64_v36 = vld [vmem:[%s2169_s0 + $0x8] sm:$0xff]  ;;  %v66_v45 = vld [vmem:[%s2169_s0 + $0x18] sm:$0xff] }
   0xd   :  { %v65_v51 = vld [vmem:[%s2169_s0 + $0x10] sm:$0xff]  ;;  %v27_v60 = vld [vmem:[%s2170_s3] sm:$0xff] }
   0xf   :  { %235 = vmatpush1.bf16.msra.mxu0 %v1584_v12  ;;  %276 = vmatpush1.bf16.msra.mxu1 %v1625_v19 }
  0x10   :  { %236 = vmatprep.subr.bf16.mxu0 %v1589_v13  ;;  %277 = vmatprep.subr.bf16.mxu1 %v1631_v20 }
  0x13   :  { %237 = vmatpush1.bf16.msra.mxu0 %v1613_v17  ;;  %278 = vmatpush1.bf16.msra.mxu1 %v1649_v23 }
  0x14   :  { %238 = vmatprep.subr.bf16.mxu0 %v1619_v18  ;;  %279 = vmatprep.subr.bf16.mxu1 %v1655_v24 }
  0x17   :  { %239 = vmatpush1.bf16.msra.mxu0 %v1636_v21  ;;  %280 = vmatpush1.bf16.msra.mxu1 %v1673_v27 }
  0x18   :  { %240 = vmatprep.subr.bf16.mxu0 %v1642_v22  ;;  %281 = vmatprep.subr.bf16.mxu1 %v1679_v28 }
  0x1b   :  { %241 = vmatpush1.bf16.msra.mxu0 %v1661_v25  ;;  %282 = vmatpush1.bf16.msra.mxu1 %v1695_v31 }
  0x1c   :  { %242 = vmatprep.subr.bf16.mxu0 %v1667_v26  ;;  %283 = vmatprep.subr.bf16.mxu1 %v1701_v32 }
  0x1f   :  { %243 = vmatpush1.bf16.msra.mxu0 %v1685_v29  ;;  %284 = vmatpush1.bf16.msra.mxu1 %v1708_v34 }
  0x20   :  { %345 = vmatprep.subr.bf16.mxu0 %v1518_v0  ;;  %386 = vmatprep.subr.bf16.mxu1 %v1548_v6 }
  0x22   :  { %261 = vmatmul.mubr.bf16.vlgmr.msra.gmra.mrb[0].mxu0 %v67_v33  ;;  %302 = vmatmul.mubr.bf16.vlgmr.msra.gmra.mrb[0].mxu1 %v67_v33 }
  0x23   :  { %346 = vmatpush1.bf16.msra.mxu0 %v1525_v2  ;;  %377 = vmatprep.mubr.bf16.mxu0 %v1479_v1 }
  0x24   :  { %347 = vmatprep.subr.bf16.mxu0 %v1531_v3  ;;  %387 = vmatpush1.bf16.msra.mxu1 %v1553_v7 }
  0x25   :  { %388 = vmatprep.subr.bf16.mxu1 %v1572_v10  ;;  %418 = vmatprep.mubr.bf16.mxu1 %v1479_v1 }
  0x27   :  { %348 = vmatpush1.bf16.msra.mxu0 %v1537_v4 }
  0x28   :  { %349 = vmatprep.subr.bf16.mxu0 %v1543_v5  ;;  %389 = vmatpush1.bf16.msra.mxu1 %v1577_v11 }
  0x29   :  { %390 = vmatprep.subr.bf16.mxu1 %v1594_v14 }
  0x2b   :  { %350 = vmatpush1.bf16.msra.mxu0 %v1559_v8 }
  0x2c   :  { %351 = vmatprep.subr.bf16.mxu0 %v1566_v9  ;;  %391 = vmatpush1.bf16.msra.mxu1 %v1601_v15 }
  0x2d   :  { %392 = vmatprep.subr.bf16.mxu1 %v1607_v16 }
  0x2f   :  { %352 = vmatpush1.bf16.msra.mxu0 %v1584_v12 }
  0x30   :  { %353 = vmatprep.subr.bf16.mxu0 %v1589_v13  ;;  %393 = vmatpush1.bf16.msra.mxu1 %v1625_v19 }
  0x31   :  { %394 = vmatprep.subr.bf16.mxu1 %v1631_v20 }
  0x33   :  { %354 = vmatpush1.bf16.msra.mxu0 %v1613_v17 }
  0x34   :  { %355 = vmatprep.subr.bf16.mxu0 %v1619_v18  ;;  %395 = vmatpush1.bf16.msra.mxu1 %v1649_v23 }
  0x35   :  { %396 = vmatprep.subr.bf16.mxu1 %v1655_v24 }
  0x37   :  { %356 = vmatpush1.bf16.msra.mxu0 %v1636_v21 }
  0x38   :  { %357 = vmatprep.subr.bf16.mxu0 %v1642_v22  ;;  %397 = vmatpush1.bf16.msra.mxu1 %v1673_v27 }
  0x39   :  { %398 = vmatprep.subr.bf16.mxu1 %v1679_v28 }
  0x3b   :  { %358 = vmatpush1.bf16.msra.mxu0 %v1661_v25 }
  0x3c   :  { %359 = vmatprep.subr.bf16.mxu0 %v1667_v26  ;;  %399 = vmatpush1.bf16.msra.mxu1 %v1695_v31 }
  0x3d   :  { %400 = vmatprep.subr.bf16.mxu1 %v1701_v32 }
  0x3f   :  { %360 = vmatpush1.bf16.msra.mxu0 %v1685_v29 }
  0x40   :  { %463 = vmatprep.subr.bf16.mxu0 %v1518_v0  ;;  %401 = vmatpush1.bf16.msra.mxu1 %v1708_v34 }
  0x41   :  { %504 = vmatprep.subr.bf16.mxu1 %v1548_v6 }
  0xf5   :  { %v262_v37 = vpop.f32.mrb[0].mxu0  ;;  %v303_v46 = vpop.f32.mrb[0].mxu1 }
  0xf6   :  { %v310_v38 = vadd.f32 %v262_v37, %v63_v35  ;;  %v264_v39 = vpop.f32.mrb[1].mxu0  ;;  %v305_v47 = vpop.f32.mrb[1].mxu1  ;;  %v312_v53 = vadd.f32 %v303_v46, %v65_v51 }
  0xf7   :  { %v311_v40 = vadd.f32 %v264_v39, %v64_v36  ;;  %v266_v41 = vpop.f32.mrb[2].mxu0  ;;  %v313_v48 = vadd.f32 %v305_v47, %v66_v45  ;;  %v307_v49 = vpop.f32.mrb[2].mxu1 }
  0xf8   :  { %v1211_v42 = vmul.f32 -1.442695, %v310_v38  ;;  %v267_v43 = vpop.f32.mrb[3].mxu0  ;;  %v308_v50 = vpop.f32.mrb[3].mxu1  ;;  %v1215_v41 = vld [vmem:[%s2169_s0 + $0x28] sm:$0xff] }
  0xf9   :  { %v1212_v44 = vmul.f32 -1.442695, %v311_v40  ;;  %v1213_v52 = vmul.f32 -1.442695, %v313_v48  ;;  %v1214_v40 = vld [vmem:[%s2169_s0 + $0x20] sm:$0xff] }
  0xfa   :  { %1319 = vpow2.f32 %v1211_v42 }
  0xfb   :  { %1321 = vpow2.f32 %v1212_v44 }
  0xfc   :  { %1323 = vpow2.f32 %v1213_v52 }
  0xfd   :  { %1325 = vtanh.f32 %v312_v53 }
 0x104   :  { %v1320_v54 = vpop.eup %1319 }
 0x105   :  { %v1322_v55 = vpop.eup %1321  ;;  %v317_v56 = vadd.f32 1.0, %v1320_v54  ;;  %v1217_v54 = vld [vmem:[%s2169_s0 + $0x38] sm:$0xff] }
 0x106   :  { %v323_v57 = vadd.f32 1.0, %v1322_v55  ;;  %v1324_v58 = vpop.eup %1323 }
 0x107   :  { %1327 = vrcp.f32 %v317_v56  ;;  %v1326_v59 = vpop.eup %1325  ;;  %v330_v62 = vadd.f32 1.0, %v1324_v58  ;;  %v1216_v56 = vld [vmem:[%s2169_s0 + $0x30] sm:$0xff] }
 0x108   :  { %1329 = vrcp.f32 %v323_v57 }
 0x109   :  { %1331 = vrcp.f32 %v330_v62 }
 0x111   :  { %v1328_v61 = vpop.eup %1327 }
 0x112   :  { %v1330_v63 = vpop.eup %1329  ;;  %v334_v30 = vmul.f32 %v1328_v61, %v1326_v59 }
 0x113   :  { %v333_v33 = vmul.f32 %v1330_v63, %v27_v60  ;;  %v1332_v36 = vpop.eup %1331 }
 0x115   :  { %v1763_v35 = vadd.f32 %v334_v30, %v333_v33 }
 0x117   :  { %1333 = vtanh.f32 %v1763_v35 }
 0x121   :  { %v1334_v37 = vpop.eup %1333 }
 0x122   :  { %v337_v38 = vmul.f32 %v1334_v37, %v1332_v36 }
 0x124   :  { %338 = vst [vmem:[%s2171_s4] sm:$0xff] %v337_v38  ;;  %v344_v39 = vpack.c.bf16 %v337_v38, %v337_v38 }
 0x126   :  { %378 = vmatmul.mubr.bf16.vlgmr.msra.gmra.mrb[4].mxu0 %v344_v39  ;;  %419 = vmatmul.mubr.bf16.vlgmr.msra.gmra.mrb[4].mxu1 %v344_v39 }
 0x127   :  { %464 = vmatpush1.bf16.msra.mxu0 %v1525_v2  ;;  %505 = vmatpush1.bf16.msra.mxu1 %v1553_v7 }
 0x128   :  { %465 = vmatprep.subr.bf16.mxu0 %v1531_v3  ;;  %506 = vmatprep.subr.bf16.mxu1 %v1572_v10 }
 0x129   :  { %495 = vmatprep.mubr.bf16.mxu0 %v1479_v1  ;;  %536 = vmatprep.mubr.bf16.mxu1 %v1479_v1 }
 0x12b   :  { %466 = vmatpush1.bf16.msra.mxu0 %v1537_v4  ;;  %507 = vmatpush1.bf16.msra.mxu1 %v1577_v11 }
 0x12c   :  { %467 = vmatprep.subr.bf16.mxu0 %v1543_v5  ;;  %508 = vmatprep.subr.bf16.mxu1 %v1594_v14 }
 0x12f   :  { %468 = vmatpush1.bf16.msra.mxu0 %v1559_v8  ;;  %509 = vmatpush1.bf16.msra.mxu1 %v1601_v15 }
 0x130   :  { %469 = vmatprep.subr.bf16.mxu0 %v1566_v9  ;;  %510 = vmatprep.subr.bf16.mxu1 %v1607_v16 }
 0x133   :  { %470 = vmatpush1.bf16.msra.mxu0 %v1584_v12  ;;  %511 = vmatpush1.bf16.msra.mxu1 %v1625_v19 }
 0x134   :  { %471 = vmatprep.subr.bf16.mxu0 %v1589_v13  ;;  %512 = vmatprep.subr.bf16.mxu1 %v1631_v20 }
 0x137   :  { %472 = vmatpush1.bf16.msra.mxu0 %v1613_v17  ;;  %513 = vmatpush1.bf16.msra.mxu1 %v1649_v23 }
 0x138   :  { %473 = vmatprep.subr.bf16.mxu0 %v1619_v18  ;;  %514 = vmatprep.subr.bf16.mxu1 %v1655_v24 }
 0x13b   :  { %474 = vmatpush1.bf16.msra.mxu0 %v1636_v21  ;;  %515 = vmatpush1.bf16.msra.mxu1 %v1673_v27 }
 0x13c   :  { %475 = vmatprep.subr.bf16.mxu0 %v1642_v22  ;;  %516 = vmatprep.subr.bf16.mxu1 %v1679_v28 }
 0x13f   :  { %476 = vmatpush1.bf16.msra.mxu0 %v1661_v25  ;;  %517 = vmatpush1.bf16.msra.mxu1 %v1695_v31 }
 0x140   :  { %477 = vmatprep.subr.bf16.mxu0 %v1667_v26  ;;  %518 = vmatprep.subr.bf16.mxu1 %v1701_v32 }
 0x143   :  { %478 = vmatpush1.bf16.msra.mxu0 %v1685_v29  ;;  %519 = vmatpush1.bf16.msra.mxu1 %v1708_v34 }
 0x144   :  { %581 = vmatprep.subr.bf16.mxu0 %v1518_v0  ;;  %622 = vmatprep.subr.bf16.mxu1 %v1548_v6 }
 0x1f9   :  { %v379_v42 = vpop.f32.mrb[4].mxu0  ;;  %v420_v43 = vpop.f32.mrb[4].mxu1 }
 0x1fa   :  { %v427_v44 = vadd.f32 %v1214_v40, %v379_v42  ;;  %v381_v45 = vpop.f32.mrb[5].mxu0  ;;  %v422_v46 = vpop.f32.mrb[5].mxu1  ;;  %v429_v58 = vadd.f32 %v1216_v56, %v420_v43 }
 0x1fb   :  { %v428_v47 = vadd.f32 %v1215_v41, %v381_v45  ;;  %v383_v48 = vpop.f32.mrb[6].mxu0  ;;  %v424_v49 = vpop.f32.mrb[6].mxu1  ;;  %v430_v55 = vadd.f32 %v1217_v54, %v422_v46  ;;  %v1223_v45 = vld [vmem:[%s2169_s0 + $0x48] sm:$0xff] }
 0x1fc   :  { %v1218_v50 = vmul.f32 -1.442695, %v427_v44  ;;  %v384_v51 = vpop.f32.mrb[7].mxu0  ;;  %v425_v52 = vpop.f32.mrb[7].mxu1 }
 0x1fd   :  { %v1219_v53 = vmul.f32 -1.442695, %v428_v47  ;;  %v1220_v57 = vmul.f32 -1.442695, %v430_v55 }
 0x1fe   :  { %1335 = vpow2.f32 %v1218_v50 }
 0x1ff   :  { %1337 = vpow2.f32 %v1219_v53 }
 0x200   :  { %1339 = vpow2.f32 %v1220_v57 }
 0x201   :  { %1341 = vtanh.f32 %v429_v58  ;;  %v1225_v58 = vld [vmem:[%s2169_s0 + $0x58] sm:$0xff] }
 0x208   :  { %v1336_v59 = vpop.eup %1335 }
 0x209   :  { %v1338_v60 = vpop.eup %1337  ;;  %v434_v61 = vadd.f32 1.0, %v1336_v59 }
 0x20a   :  { %v440_v62 = vadd.f32 1.0, %v1338_v60  ;;  %v1340_v63 = vpop.eup %1339  ;;  %v1224_v60 = vld [vmem:[%s2169_s0 + $0x50] sm:$0xff] }
 0x20b   :  { %1343 = vrcp.f32 %v434_v61  ;;  %v1342_v30 = vpop.eup %1341  ;;  %v447_v38 = vadd.f32 1.0, %v1340_v63 }
 0x20c   :  { %1345 = vrcp.f32 %v440_v62 }
 0x20d   :  { %1347 = vrcp.f32 %v447_v38 }
 0x215   :  { %v1344_v33 = vpop.eup %1343 }
 0x216   :  { %v1346_v36 = vpop.eup %1345  ;;  %v451_v37 = vmul.f32 %v1344_v33, %v1342_v30 }
 0x217   :  { %v450_v39 = vmul.f32 %v1346_v36, %v1763_v35  ;;  %v1348_v41 = vpop.eup %1347  ;;  %v1222_v35 = vld [vmem:[%s2169_s0 + $0x40] sm:$0xff] }
 0x219   :  { %v1816_v40 = vadd.f32 %v451_v37, %v450_v39 }
 0x21b   :  { %1349 = vtanh.f32 %v1816_v40 }
 0x225   :  { %v1350_v42 = vpop.eup %1349 }
 0x226   :  { %v454_v43 = vmul.f32 %v1350_v42, %v1348_v41 }
 0x228   :  { %1221 = vst [vmem:[%s2171_s4 + $0x8] sm:$0xff] %v454_v43  ;;  %v462_v44 = vpack.c.bf16 %v454_v43, %v454_v43 }
 0x22a   :  { %496 = vmatmul.mubr.bf16.vlgmr.msra.gmra.mrb[8].mxu0 %v462_v44  ;;  %537 = vmatmul.mubr.bf16.vlgmr.msra.gmra.mrb[8].mxu1 %v462_v44 }
 0x22b   :  { %582 = vmatpush1.bf16.msra.mxu0 %v1525_v2  ;;  %623 = vmatpush1.bf16.msra.mxu1 %v1553_v7 }
 0x22c   :  { %583 = vmatprep.subr.bf16.mxu0 %v1531_v3  ;;  %624 = vmatprep.subr.bf16.mxu1 %v1572_v10 }
 0x22d   :  { %613 = vmatprep.mubr.bf16.mxu0 %v1479_v1  ;;  %654 = vmatprep.mubr.bf16.mxu1 %v1479_v1 }
 0x22f   :  { %584 = vmatpush1.bf16.msra.mxu0 %v1537_v4  ;;  %625 = vmatpush1.bf16.msra.mxu1 %v1577_v11 }
 0x230   :  { %585 = vmatprep.subr.bf16.mxu0 %v1543_v5  ;;  %626 = vmatprep.subr.bf16.mxu1 %v1594_v14 }
 0x233   :  { %586 = vmatpush1.bf16.msra.mxu0 %v1559_v8  ;;  %627 = vmatpush1.bf16.msra.mxu1 %v1601_v15 }
 0x234   :  { %587 = vmatprep.subr.bf16.mxu0 %v1566_v9  ;;  %628 = vmatprep.subr.bf16.mxu1 %v1607_v16 }
 0x237   :  { %588 = vmatpush1.bf16.msra.mxu0 %v1584_v12  ;;  %629 = vmatpush1.bf16.msra.mxu1 %v1625_v19 }
 0x238   :  { %589 = vmatprep.subr.bf16.mxu0 %v1589_v13  ;;  %630 = vmatprep.subr.bf16.mxu1 %v1631_v20 }
 0x23b   :  { %590 = vmatpush1.bf16.msra.mxu0 %v1613_v17  ;;  %631 = vmatpush1.bf16.msra.mxu1 %v1649_v23 }
 0x23c   :  { %591 = vmatprep.subr.bf16.mxu0 %v1619_v18  ;;  %632 = vmatprep.subr.bf16.mxu1 %v1655_v24 }
 0x23f   :  { %592 = vmatpush1.bf16.msra.mxu0 %v1636_v21  ;;  %633 = vmatpush1.bf16.msra.mxu1 %v1673_v27 }
 0x240   :  { %593 = vmatprep.subr.bf16.mxu0 %v1642_v22  ;;  %634 = vmatprep.subr.bf16.mxu1 %v1679_v28 }
 0x243   :  { %594 = vmatpush1.bf16.msra.mxu0 %v1661_v25  ;;  %635 = vmatpush1.bf16.msra.mxu1 %v1695_v31 }
 0x244   :  { %595 = vmatprep.subr.bf16.mxu0 %v1667_v26  ;;  %636 = vmatprep.subr.bf16.mxu1 %v1701_v32 }
 0x247   :  { %596 = vmatpush1.bf16.msra.mxu0 %v1685_v29  ;;  %637 = vmatpush1.bf16.msra.mxu1 %v1708_v34 }
 0x248   :  { %699 = vmatprep.subr.bf16.mxu0 %v1518_v0  ;;  %740 = vmatprep.subr.bf16.mxu1 %v1548_v6 }
 0x2fd   :  { %v497_v46 = vpop.f32.mrb[8].mxu0  ;;  %v538_v47 = vpop.f32.mrb[8].mxu1 }
 0x2fe   :  { %v545_v48 = vadd.f32 %v1222_v35, %v497_v46  ;;  %v499_v49 = vpop.f32.mrb[9].mxu0  ;;  %v540_v50 = vpop.f32.mrb[9].mxu1  ;;  %v547_v62 = vadd.f32 %v1224_v60, %v538_v47 }
 0x2ff   :  { %v546_v51 = vadd.f32 %v1223_v45, %v499_v49  ;;  %v501_v52 = vpop.f32.mrb[10].mxu0  ;;  %v542_v53 = vpop.f32.mrb[10].mxu1  ;;  %v548_v59 = vadd.f32 %v1225_v58, %v540_v50  ;;  %v1231_v49 = vld [vmem:[%s2169_s0 + $0x68] sm:$0xff] }
 0x300   :  { %v1226_v54 = vmul.f32 -1.442695, %v545_v48  ;;  %v502_v55 = vpop.f32.mrb[11].mxu0  ;;  %v543_v56 = vpop.f32.mrb[11].mxu1 }
 0x301   :  { %v1227_v57 = vmul.f32 -1.442695, %v546_v51  ;;  %v1228_v61 = vmul.f32 -1.442695, %v548_v59 }
 0x302   :  { %1351 = vpow2.f32 %v1226_v54 }
 0x303   :  { %1353 = vpow2.f32 %v1227_v57 }
 0x304   :  { %1355 = vpow2.f32 %v1228_v61 }
 0x305   :  { %1357 = vtanh.f32 %v547_v62  ;;  %v1233_v62 = vld [vmem:[%s2169_s0 + $0x78] sm:$0xff] }
 0x30c   :  { %v1352_v63 = vpop.eup %1351 }
 0x30d   :  { %v1354_v30 = vpop.eup %1353  ;;  %v552_v33 = vadd.f32 1.0, %v1352_v63 }
 0x30e   :  { %v558_v36 = vadd.f32 1.0, %v1354_v30  ;;  %v1356_v37 = vpop.eup %1355  ;;  %v1232_v30 = vld [vmem:[%s2169_s0 + $0x70] sm:$0xff] }
 0x30f   :  { %1359 = vrcp.f32 %v552_v33  ;;  %v1358_v38 = vpop.eup %1357  ;;  %v565_v43 = vadd.f32 1.0, %v1356_v37 }
 0x310   :  { %1361 = vrcp.f32 %v558_v36 }
 0x311   :  { %1363 = vrcp.f32 %v565_v43 }
 0x319   :  { %v1360_v39 = vpop.eup %1359 }
 0x31a   :  { %v1362_v41 = vpop.eup %1361  ;;  %v569_v42 = vmul.f32 %v1360_v39, %v1358_v38 }
 0x31b   :  { %v568_v44 = vmul.f32 %v1362_v41, %v1816_v40  ;;  %v1364_v45 = vpop.eup %1363  ;;  %v1230_v40 = vld [vmem:[%s2169_s0 + $0x60] sm:$0xff] }
 0x31d   :  { %v1869_v35 = vadd.f32 %v569_v42, %v568_v44 }
 0x31f   :  { %1365 = vtanh.f32 %v1869_v35 }
 0x329   :  { %v1366_v46 = vpop.eup %1365 }
 0x32a   :  { %v572_v47 = vmul.f32 %v1366_v46, %v1364_v45 }
 0x32c   :  { %1229 = vst [vmem:[%s2171_s4 + $0x10] sm:$0xff] %v572_v47  ;;  %v580_v48 = vpack.c.bf16 %v572_v47, %v572_v47 }
 0x32e   :  { %614 = vmatmul.mubr.bf16.vlgmr.msra.gmra.mrb[12].mxu0 %v580_v48  ;;  %655 = vmatmul.mubr.bf16.vlgmr.msra.gmra.mrb[12].mxu1 %v580_v48 }
 0x32f   :  { %700 = vmatpush1.bf16.msra.mxu0 %v1525_v2  ;;  %741 = vmatpush1.bf16.msra.mxu1 %v1553_v7 }
 0x330   :  { %701 = vmatprep.subr.bf16.mxu0 %v1531_v3  ;;  %742 = vmatprep.subr.bf16.mxu1 %v1572_v10 }
 0x331   :  { %731 = vmatprep.mubr.bf16.mxu0 %v1479_v1  ;;  %772 = vmatprep.mubr.bf16.mxu1 %v1479_v1 }
 0x333   :  { %702 = vmatpush1.bf16.msra.mxu0 %v1537_v4  ;;  %743 = vmatpush1.bf16.msra.mxu1 %v1577_v11 }
 0x334   :  { %703 = vmatprep.subr.bf16.mxu0 %v1543_v5  ;;  %744 = vmatprep.subr.bf16.mxu1 %v1594_v14 }
 0x337   :  { %704 = vmatpush1.bf16.msra.mxu0 %v1559_v8  ;;  %745 = vmatpush1.bf16.msra.mxu1 %v1601_v15 }
 0x338   :  { %705 = vmatprep.subr.bf16.mxu0 %v1566_v9  ;;  %746 = vmatprep.subr.bf16.mxu1 %v1607_v16 }
 0x33b   :  { %706 = vmatpush1.bf16.msra.mxu0 %v1584_v12  ;;  %747 = vmatpush1.bf16.msra.mxu1 %v1625_v19 }
 0x33c   :  { %707 = vmatprep.subr.bf16.mxu0 %v1589_v13  ;;  %748 = vmatprep.subr.bf16.mxu1 %v1631_v20 }
 0x33f   :  { %708 = vmatpush1.bf16.msra.mxu0 %v1613_v17  ;;  %749 = vmatpush1.bf16.msra.mxu1 %v1649_v23 }
 0x340   :  { %709 = vmatprep.subr.bf16.mxu0 %v1619_v18  ;;  %750 = vmatprep.subr.bf16.mxu1 %v1655_v24 }
 0x343   :  { %710 = vmatpush1.bf16.msra.mxu0 %v1636_v21  ;;  %751 = vmatpush1.bf16.msra.mxu1 %v1673_v27 }
 0x344   :  { %711 = vmatprep.subr.bf16.mxu0 %v1642_v22  ;;  %752 = vmatprep.subr.bf16.mxu1 %v1679_v28 }
 0x347   :  { %712 = vmatpush1.bf16.msra.mxu0 %v1661_v25  ;;  %753 = vmatpush1.bf16.msra.mxu1 %v1695_v31 }
 0x348   :  { %713 = vmatprep.subr.bf16.mxu0 %v1667_v26  ;;  %754 = vmatprep.subr.bf16.mxu1 %v1701_v32 }
 0x34b   :  { %714 = vmatpush1.bf16.msra.mxu0 %v1685_v29  ;;  %755 = vmatpush1.bf16.msra.mxu1 %v1708_v34 }
 0x34c   :  { %817 = vmatprep.subr.bf16.mxu0 %v1518_v0  ;;  %858 = vmatprep.subr.bf16.mxu1 %v1548_v6 }
 0x401   :  { %v615_v50 = vpop.f32.mrb[12].mxu0  ;;  %v656_v51 = vpop.f32.mrb[12].mxu1 }
 0x402   :  { %v663_v52 = vadd.f32 %v1230_v40, %v615_v50  ;;  %v617_v53 = vpop.f32.mrb[13].mxu0  ;;  %v658_v54 = vpop.f32.mrb[13].mxu1  ;;  %v665_v36 = vadd.f32 %v1232_v30, %v656_v51  ;;  %v1241_v30 = vld [vmem:[%s2169_s0 + $0x98] sm:$0xff] }
 0x403   :  { %v664_v55 = vadd.f32 %v1231_v49, %v617_v53  ;;  %v619_v56 = vpop.f32.mrb[14].mxu0  ;;  %v660_v57 = vpop.f32.mrb[14].mxu1  ;;  %v666_v63 = vadd.f32 %v1233_v62, %v658_v54  ;;  %v1239_v53 = vld [vmem:[%s2169_s0 + $0x88] sm:$0xff] }
 0x404   :  { %v1234_v58 = vmul.f32 -1.442695, %v663_v52  ;;  %v620_v59 = vpop.f32.mrb[15].mxu0  ;;  %v661_v60 = vpop.f32.mrb[15].mxu1 }
 0x405   :  { %v1235_v61 = vmul.f32 -1.442695, %v664_v55  ;;  %v1236_v33 = vmul.f32 -1.442695, %v666_v63 }
 0x406   :  { %1367 = vpow2.f32 %v1234_v58 }
 0x407   :  { %1369 = vpow2.f32 %v1235_v61 }
 0x408   :  { %1371 = vpow2.f32 %v1236_v33 }
 0x409   :  { %1373 = vtanh.f32 %v665_v36  ;;  %v1240_v36 = vld [vmem:[%s2169_s0 + $0x90] sm:$0xff] }
 0x410   :  { %v1368_v37 = vpop.eup %1367 }
 0x411   :  { %v1370_v38 = vpop.eup %1369  ;;  %v670_v39 = vadd.f32 1.0, %v1368_v37 }
 0x412   :  { %v676_v41 = vadd.f32 1.0, %v1370_v38  ;;  %v1372_v42 = vpop.eup %1371 }
 0x413   :  { %1375 = vrcp.f32 %v670_v39  ;;  %v1374_v43 = vpop.eup %1373  ;;  %v683_v47 = vadd.f32 1.0, %v1372_v42 }
 0x414   :  { %1377 = vrcp.f32 %v676_v41 }
 0x415   :  { %1379 = vrcp.f32 %v683_v47 }
 0x41d   :  { %v1376_v44 = vpop.eup %1375 }
 0x41e   :  { %v1378_v45 = vpop.eup %1377  ;;  %v687_v46 = vmul.f32 %v1376_v44, %v1374_v43 }
 0x41f   :  { %v686_v48 = vmul.f32 %v1378_v45, %v1869_v35  ;;  %v1380_v49 = vpop.eup %1379  ;;  %v1238_v35 = vld [vmem:[%s2169_s0 + $0x80] sm:$0xff] }
 0x421   :  { %v1922_v40 = vadd.f32 %v687_v46, %v686_v48 }
 0x423   :  { %1381 = vtanh.f32 %v1922_v40 }
 0x42d   :  { %v1382_v50 = vpop.eup %1381 }
 0x42e   :  { %v690_v51 = vmul.f32 %v1382_v50, %v1380_v49 }
 0x430   :  { %1237 = vst [vmem:[%s2171_s4 + $0x18] sm:$0xff] %v690_v51  ;;  %v698_v52 = vpack.c.bf16 %v690_v51, %v690_v51 }
 0x432   :  { %732 = vmatmul.mubr.bf16.vlgmr.msra.gmra.mrb[16].mxu0 %v698_v52  ;;  %773 = vmatmul.mubr.bf16.vlgmr.msra.gmra.mrb[16].mxu1 %v698_v52 }
 0x433   :  { %818 = vmatpush1.bf16.msra.mxu0 %v1525_v2  ;;  %859 = vmatpush1.bf16.msra.mxu1 %v1553_v7 }
 0x434   :  { %819 = vmatprep.subr.bf16.mxu0 %v1531_v3  ;;  %860 = vmatprep.subr.bf16.mxu1 %v1572_v10 }
 0x435   :  { %849 = vmatprep.mubr.bf16.mxu0 %v1479_v1  ;;  %890 = vmatprep.mubr.bf16.mxu1 %v1479_v1 }
 0x437   :  { %820 = vmatpush1.bf16.msra.mxu0 %v1537_v4  ;;  %861 = vmatpush1.bf16.msra.mxu1 %v1577_v11 }
 0x438   :  { %821 = vmatprep.subr.bf16.mxu0 %v1543_v5  ;;  %862 = vmatprep.subr.bf16.mxu1 %v1594_v14 }
 0x43b   :  { %822 = vmatpush1.bf16.msra.mxu0 %v1559_v8  ;;  %863 = vmatpush1.bf16.msra.mxu1 %v1601_v15 }
 0x43c   :  { %823 = vmatprep.subr.bf16.mxu0 %v1566_v9  ;;  %864 = vmatprep.subr.bf16.mxu1 %v1607_v16 }
 0x43f   :  { %824 = vmatpush1.bf16.msra.mxu0 %v1584_v12  ;;  %865 = vmatpush1.bf16.msra.mxu1 %v1625_v19 }
 0x440   :  { %825 = vmatprep.subr.bf16.mxu0 %v1589_v13  ;;  %866 = vmatprep.subr.bf16.mxu1 %v1631_v20 }
 0x443   :  { %826 = vmatpush1.bf16.msra.mxu0 %v1613_v17  ;;  %867 = vmatpush1.bf16.msra.mxu1 %v1649_v23 }
 0x444   :  { %827 = vmatprep.subr.bf16.mxu0 %v1619_v18  ;;  %868 = vmatprep.subr.bf16.mxu1 %v1655_v24 }
 0x447   :  { %828 = vmatpush1.bf16.msra.mxu0 %v1636_v21  ;;  %869 = vmatpush1.bf16.msra.mxu1 %v1673_v27 }
 0x448   :  { %829 = vmatprep.subr.bf16.mxu0 %v1642_v22  ;;  %870 = vmatprep.subr.bf16.mxu1 %v1679_v28 }
 0x44b   :  { %830 = vmatpush1.bf16.msra.mxu0 %v1661_v25  ;;  %871 = vmatpush1.bf16.msra.mxu1 %v1695_v31 }
 0x44c   :  { %831 = vmatprep.subr.bf16.mxu0 %v1667_v26  ;;  %872 = vmatprep.subr.bf16.mxu1 %v1701_v32 }
 0x44f   :  { %832 = vmatpush1.bf16.msra.mxu0 %v1685_v29  ;;  %873 = vmatpush1.bf16.msra.mxu1 %v1708_v34 }
 0x450   :  { %935 = vmatprep.subr.bf16.mxu0 %v1518_v0  ;;  %976 = vmatprep.subr.bf16.mxu1 %v1548_v6 }
 0x505   :  { %v733_v54 = vpop.f32.mrb[16].mxu0  ;;  %v774_v55 = vpop.f32.mrb[16].mxu1 }
 0x506   :  { %v781_v56 = vadd.f32 %v1238_v35, %v733_v54  ;;  %v735_v57 = vpop.f32.mrb[17].mxu0  ;;  %v776_v58 = vpop.f32.mrb[17].mxu1  ;;  %v783_v38 = vadd.f32 %v1240_v36, %v774_v55  ;;  %v1456_v36 = vld [vmem:[%s2167_s1 + $0x4c] ss:$16 sps:$4 sm:$0xff]  }
 0x507   :  { %v782_v59 = vadd.f32 %v1239_v53, %v735_v57  ;;  %v737_v60 = vpop.f32.mrb[18].mxu0  ;;  %v778_v61 = vpop.f32.mrb[18].mxu1  ;;  %v784_v33 = vadd.f32 %v1241_v30, %v776_v58  ;;  %v1454_v30 = vld [vmem:[%s2167_s1 + $0x28] ss:$16 sps:$4 sm:$0xff]  }
 0x508   :  { %v1242_v62 = vmul.f32 -1.442695, %v781_v56  ;;  %v738_v0 = vpop.f32.mrb[19].mxu0  ;;  %v779_v63 = vpop.f32.mrb[19].mxu1  ;;  %v1449_v61 = vld [vmem:[%s2167_s1] ss:$16 sps:$4 sm:$0xff]  }
 0x509   :  { %v1243_v6 = vmul.f32 -1.442695, %v782_v59  ;;  %v1244_v37 = vmul.f32 -1.442695, %v784_v33  ;;  %v1451_v0 = vld [vmem:[%s2167_s1 + $0x24] ss:$16 sps:$4 sm:$0xff]  }
 0x50a   :  { %1383 = vpow2.f32 %v1242_v62  ;;  %v1450_v62 = vld [vmem:[%s2167_s1 + $0x8] ss:$16 sps:$4 sm:$0xff]   ;;  %v1452_v63 = vld [vmem:[%s2167_s1 + $0x2c] ss:$16 sps:$4 sm:$0xff]   ;;  %v1455_v33 = vld [vmem:[%s2167_s1 + $0x44] ss:$16 sps:$4 sm:$0xff]  }
 0x50b   :  { %1385 = vpow2.f32 %v1243_v6  ;;  %v1453_v6 = vld [vmem:[%s2167_s1 + $0x20] ss:$16 sps:$4 sm:$0xff]  }
 0x50c   :  { %1387 = vpow2.f32 %v1244_v37  ;;  %v1458_v37 = vld [vmem:[%s2167_s1 + $0x48] ss:$16 sps:$4 sm:$0xff]  }
 0x50d   :  { %1389 = vtanh.f32 %v783_v38  ;;  %v1459_v38 = vld [vmem:[%s2167_s1 + $0x64] ss:$16 sps:$4 sm:$0xff]  }
 0x514   :  { %v1384_v39 = vpop.eup %1383 }
 0x515   :  { %v1386_v41 = vpop.eup %1385  ;;  %v788_v42 = vadd.f32 1.0, %v1384_v39  ;;  %v1460_v39 = vld [vmem:[%s2167_s1 + $0x6c] ss:$16 sps:$4 sm:$0xff]  }
 0x516   :  { %v794_v43 = vadd.f32 1.0, %v1386_v41  ;;  %v1388_v44 = vpop.eup %1387  ;;  %v1461_v41 = vld [vmem:[%s2167_s1 + $0x60] ss:$16 sps:$4 sm:$0xff]  }
 0x517   :  { %1391 = vrcp.f32 %v788_v42  ;;  %v1390_v45 = vpop.eup %1389  ;;  %v801_v49 = vadd.f32 1.0, %v1388_v44  ;;  %v1462_v42 = vld [vmem:[%s2167_s1 + $0x68] ss:$16 sps:$4 sm:$0xff]   ;;  %v1464_v44 = vld [vmem:[%s2167_s1 + $0x8c] ss:$16 sps:$4 sm:$0xff]  }
 0x518   :  { %1393 = vrcp.f32 %v794_v43  ;;  %v1463_v43 = vld [vmem:[%s2167_s1 + $0x84] ss:$16 sps:$4 sm:$0xff]  }
 0x519   :  { %1395 = vrcp.f32 %v801_v49  ;;  %v1469_v49 = vld [vmem:[%s2167_s1 + $0xa0] ss:$16 sps:$4 sm:$0xff]  }
 0x521   :  { %v1392_v46 = vpop.eup %1391 }
 0x522   :  { %v1394_v47 = vpop.eup %1393  ;;  %v805_v48 = vmul.f32 %v1392_v46, %v1390_v45  ;;  %v1465_v45 = vld [vmem:[%s2167_s1 + $0x80] ss:$16 sps:$4 sm:$0xff]   ;;  %v1466_v46 = vld [vmem:[%s2167_s1 + $0x88] ss:$16 sps:$4 sm:$0xff]  }
 0x523   :  { %v804_v50 = vmul.f32 %v1394_v47, %v1922_v40  ;;  %v1396_v52 = vpop.eup %1395  ;;  %v1467_v47 = vld [vmem:[%s2167_s1 + $0xa4] ss:$16 sps:$4 sm:$0xff]  }
 0x525   :  { %v1975_v51 = vadd.f32 %v805_v48, %v804_v50  ;;  %v1468_v48 = vld [vmem:[%s2167_s1 + $0xac] ss:$16 sps:$4 sm:$0xff]   ;;  %v1470_v50 = vld [vmem:[%s2167_s1 + $0xa8] ss:$16 sps:$4 sm:$0xff]  }
 0x527   :  { %1397 = vtanh.f32 %v1975_v51 }
 0x531   :  { %v1398_v35 = vpop.eup %1397 }
 0x532   :  { %v808_v53 = vmul.f32 %v1398_v35, %v1396_v52  ;;  %v1472_v52 = vld [vmem:[%s2167_s1 + $0xcc] ss:$16 sps:$4 sm:$0xff]   ;;  %v1473_v35 = vld [vmem:[%s2167_s1 + $0xc0] ss:$16 sps:$4 sm:$0xff]  }
 0x534   :  { %1245 = vst [vmem:[%s2171_s4 + $0x20] sm:$0xff] %v808_v53  ;;  %v816_v54 = vpack.c.bf16 %v808_v53, %v808_v53  ;;  %v1474_v53 = vld [vmem:[%s2167_s1 + $0xc8] ss:$16 sps:$4 sm:$0xff]  }
 0x536   :  { %850 = vmatmul.mubr.bf16.vlgmr.msra.gmra.mrb[20].mxu0 %v816_v54  ;;  %891 = vmatmul.mubr.bf16.vlgmr.msra.gmra.mrb[20].mxu1 %v816_v54  ;;  %v1475_v54 = vld [vmem:[%s2167_s1 + $0xe4] ss:$16 sps:$4 sm:$0xff]  }
 0x537   :  { %936 = vmatpush1.bf16.msra.mxu0 %v1525_v2  ;;  %977 = vmatpush1.bf16.msra.mxu1 %v1553_v7  ;;  %v1447_v2 = vld [vmem:[%s2167_s1 + $0x4] ss:$16 sps:$4 sm:$0xff]  }
 0x538   :  { %937 = vmatprep.subr.bf16.mxu0 %v1531_v3  ;;  %978 = vmatprep.subr.bf16.mxu1 %v1572_v10  ;;  %v1448_v3 = vld [vmem:[%s2167_s1 + $0xc] ss:$16 sps:$4 sm:$0xff]  }
 0x539   :  { %967 = vmatprep.mubr.bf16.mxu0 %v1479_v1  ;;  %1008 = vmatprep.mubr.bf16.mxu1 %v1479_v1 }
 0x53b   :  { %938 = vmatpush1.bf16.msra.mxu0 %v1537_v4  ;;  %979 = vmatpush1.bf16.msra.mxu1 %v1577_v11  ;;  %v1246_v4 = vld [vmem:[%s2169_s0 + $0xa0] sm:$0xff] }
 0x53c   :  { %939 = vmatprep.subr.bf16.mxu0 %v1543_v5  ;;  %980 = vmatprep.subr.bf16.mxu1 %v1594_v14  ;;  %v1247_v5 = vld [vmem:[%s2169_s0 + $0xa8] sm:$0xff] }
 0x53f   :  { %940 = vmatpush1.bf16.msra.mxu0 %v1559_v8  ;;  %981 = vmatpush1.bf16.msra.mxu1 %v1601_v15 }
 0x540   :  { %941 = vmatprep.subr.bf16.mxu0 %v1566_v9  ;;  %982 = vmatprep.subr.bf16.mxu1 %v1607_v16 }
 0x543   :  { %942 = vmatpush1.bf16.msra.mxu0 %v1584_v12  ;;  %983 = vmatpush1.bf16.msra.mxu1 %v1625_v19  ;;  %v1249_v19 = vld [vmem:[%s2169_s0 + $0xb8] sm:$0xff] }
 0x544   :  { %943 = vmatprep.subr.bf16.mxu0 %v1589_v13  ;;  %984 = vmatprep.subr.bf16.mxu1 %v1631_v20 }
 0x547   :  { %944 = vmatpush1.bf16.msra.mxu0 %v1613_v17  ;;  %985 = vmatpush1.bf16.msra.mxu1 %v1649_v23 }
 0x548   :  { %945 = vmatprep.subr.bf16.mxu0 %v1619_v18  ;;  %986 = vmatprep.subr.bf16.mxu1 %v1655_v24 }
 0x54b   :  { %946 = vmatpush1.bf16.msra.mxu0 %v1636_v21  ;;  %987 = vmatpush1.bf16.msra.mxu1 %v1673_v27  ;;  %v1248_v21 = vld [vmem:[%s2169_s0 + $0xb0] sm:$0xff] }
 0x54c   :  { %947 = vmatprep.subr.bf16.mxu0 %v1642_v22  ;;  %988 = vmatprep.subr.bf16.mxu1 %v1679_v28 }
 0x54f   :  { %948 = vmatpush1.bf16.msra.mxu0 %v1661_v25  ;;  %989 = vmatpush1.bf16.msra.mxu1 %v1695_v31 }
 0x550   :  { %949 = vmatprep.subr.bf16.mxu0 %v1667_v26  ;;  %990 = vmatprep.subr.bf16.mxu1 %v1701_v32 }
 0x553   :  { %950 = vmatpush1.bf16.msra.mxu0 %v1685_v29  ;;  %991 = vmatpush1.bf16.msra.mxu1 %v1708_v34 }
 0x554   :  { %1053 = vmatprep.subr.bf16.mxu0 %v1447_v2  ;;  %1094 = vmatprep.subr.bf16.mxu1 %v1448_v3  ;;  %v1476_v2 = vld [vmem:[%s2167_s1 + $0xec] ss:$16 sps:$4 sm:$0xff]   ;;  %v1477_v3 = vld [vmem:[%s2167_s1 + $0xe0] ss:$16 sps:$4 sm:$0xff]  }
 0x609   :  { %v851_v7 = vpop.f32.mrb[20].mxu0  ;;  %v892_v8 = vpop.f32.mrb[20].mxu1 }
 0x60a   :  { %v899_v9 = vadd.f32 %v1246_v4, %v851_v7  ;;  %v853_v10 = vpop.f32.mrb[21].mxu0  ;;  %v894_v11 = vpop.f32.mrb[21].mxu1  ;;  %v901_v23 = vadd.f32 %v1248_v21, %v892_v8  ;;  %v1478_v4 = vld [vmem:[%s2167_s1 + $0xe8] ss:$16 sps:$4 sm:$0xff]  }
 0x60b   :  { %v900_v12 = vadd.f32 %v1247_v5, %v853_v10  ;;  %v855_v13 = vpop.f32.mrb[22].mxu0  ;;  %v896_v14 = vpop.f32.mrb[22].mxu1  ;;  %v902_v20 = vadd.f32 %v1249_v19, %v894_v11  ;;  %v1254_v5 = vld [vmem:[%s2169_s0 + $0xc0] sm:$0xff]  ;;  %v1255_v7 = vld [vmem:[%s2169_s0 + $0xc8] sm:$0xff] }
 0x60c   :  { %v1250_v15 = vmul.f32 -1.442695, %v899_v9  ;;  %v856_v16 = vpop.f32.mrb[23].mxu0  ;;  %v897_v17 = vpop.f32.mrb[23].mxu1 }
 0x60d   :  { %v1251_v18 = vmul.f32 -1.442695, %v900_v12  ;;  %v1252_v22 = vmul.f32 -1.442695, %v902_v20  ;;  %v1257_v20 = vld [vmem:[%s2169_s0 + $0xd8] sm:$0xff] }
 0x60e   :  { %1399 = vpow2.f32 %v1250_v15 }
 0x60f   :  { %1401 = vpow2.f32 %v1251_v18 }
 0x610   :  { %1403 = vpow2.f32 %v1252_v22  ;;  %v1256_v22 = vld [vmem:[%s2169_s0 + $0xd0] sm:$0xff] }
 0x611   :  { %1405 = vtanh.f32 %v901_v23 }
 0x618   :  { %v1400_v24 = vpop.eup %1399 }
 0x619   :  { %v1402_v25 = vpop.eup %1401  ;;  %v906_v26 = vadd.f32 1.0, %v1400_v24 }
 0x61a   :  { %v912_v27 = vadd.f32 1.0, %v1402_v25  ;;  %v1404_v28 = vpop.eup %1403 }
 0x61b   :  { %1407 = vrcp.f32 %v906_v26  ;;  %v1406_v29 = vpop.eup %1405  ;;  %v919_v40 = vadd.f32 1.0, %v1404_v28 }
 0x61c   :  { %1409 = vrcp.f32 %v912_v27 }
 0x61d   :  { %1411 = vrcp.f32 %v919_v40 }
 0x625   :  { %v1408_v31 = vpop.eup %1407 }
 0x626   :  { %v1410_v32 = vpop.eup %1409  ;;  %v923_v34 = vmul.f32 %v1408_v31, %v1406_v29 }
 0x627   :  { %v922_v55 = vmul.f32 %v1410_v32, %v1975_v51  ;;  %v1412_v57 = vpop.eup %1411  ;;  %v1471_v51 = vld [vmem:[%s2167_s1 + $0xc4] ss:$16 sps:$4 sm:$0xff]  }
 0x629   :  { %v2032_v56 = vadd.f32 %v923_v34, %v922_v55 }
 0x62b   :  { %1413 = vtanh.f32 %v2032_v56 }
 0x635   :  { %v1414_v58 = vpop.eup %1413 }
 0x636   :  { %v926_v59 = vmul.f32 %v1414_v58, %v1412_v57 }
 0x638   :  { %1253 = vst [vmem:[%s2171_s4 + $0x28] sm:$0xff] %v926_v59  ;;  %v934_v60 = vpack.c.bf16 %v926_v59, %v926_v59 }
 0x63a   :  { %968 = vmatmul.mubr.bf16.vlgmr.msra.gmra.mrb[24].mxu0 %v934_v60  ;;  %1009 = vmatmul.mubr.bf16.vlgmr.msra.gmra.mrb[24].mxu1 %v934_v60 }
 0x63b   :  { %1054 = vmatpush1.bf16.msra.mxu0 %v1449_v61  ;;  %1095 = vmatpush1.bf16.msra.mxu1 %v1450_v62 }
 0x63c   :  { %1055 = vmatprep.subr.bf16.mxu0 %v1451_v0  ;;  %1096 = vmatprep.subr.bf16.mxu1 %v1452_v63  ;;  %v1262_v0 = vld [vmem:[%s2169_s0 + $0xe0] sm:$0xff] }
 0x63d   :  { %1085 = vmatprep.mubr.bf16.mxu0 %v1479_v1  ;;  %1126 = vmatprep.mubr.bf16.mxu1 %v1479_v1  ;;  %v1457_v1 = vld [vmem:[%s2167_s1 + $0x40] ss:$16 sps:$4 sm:$0xff]  }
 0x63f   :  { %1056 = vmatpush1.bf16.msra.mxu0 %v1453_v6  ;;  %1097 = vmatpush1.bf16.msra.mxu1 %v1454_v30 }
 0x640   :  { %1057 = vmatprep.subr.bf16.mxu0 %v1455_v33  ;;  %1098 = vmatprep.subr.bf16.mxu1 %v1456_v36 }
 0x643   :  { %1058 = vmatpush1.bf16.msra.mxu0 %v1457_v1  ;;  %1099 = vmatpush1.bf16.msra.mxu1 %v1458_v37 }
 0x644   :  { %1059 = vmatprep.subr.bf16.mxu0 %v1459_v38  ;;  %1100 = vmatprep.subr.bf16.mxu1 %v1460_v39 }
 0x647   :  { %1060 = vmatpush1.bf16.msra.mxu0 %v1461_v41  ;;  %1101 = vmatpush1.bf16.msra.mxu1 %v1462_v42 }
 0x648   :  { %1061 = vmatprep.subr.bf16.mxu0 %v1463_v43  ;;  %1102 = vmatprep.subr.bf16.mxu1 %v1464_v44  ;;  %v1265_v44 = vld [vmem:[%s2169_s0 + $0xf8] sm:$0xff] }
 0x64b   :  { %1062 = vmatpush1.bf16.msra.mxu0 %v1465_v45  ;;  %1103 = vmatpush1.bf16.msra.mxu1 %v1466_v46  ;;  %v1264_v46 = vld [vmem:[%s2169_s0 + $0xf0] sm:$0xff] }
 0x64c   :  { %1063 = vmatprep.subr.bf16.mxu0 %v1467_v47  ;;  %1104 = vmatprep.subr.bf16.mxu1 %v1468_v48 }
 0x64f   :  { %1064 = vmatpush1.bf16.msra.mxu0 %v1469_v49  ;;  %1105 = vmatpush1.bf16.msra.mxu1 %v1470_v50 }
 0x650   :  { %1065 = vmatprep.subr.bf16.mxu0 %v1471_v51  ;;  %1106 = vmatprep.subr.bf16.mxu1 %v1472_v52 }
 0x653   :  { %1066 = vmatpush1.bf16.msra.mxu0 %v1473_v35  ;;  %1107 = vmatpush1.bf16.msra.mxu1 %v1474_v53 }
 0x654   :  { %1067 = vmatprep.subr.bf16.mxu0 %v1475_v54  ;;  %1108 = vmatprep.subr.bf16.mxu1 %v1476_v2 }
 0x657   :  { %1068 = vmatpush1.bf16.msra.mxu0 %v1477_v3  ;;  %1109 = vmatpush1.bf16.msra.mxu1 %v1478_v4 }
 0x70d   :  { %v969_v8 = vpop.f32.mrb[24].mxu0  ;;  %v1010_v9 = vpop.f32.mrb[24].mxu1 }
 0x70e   :  { %v1017_v10 = vadd.f32 %v1254_v5, %v969_v8  ;;  %v971_v11 = vpop.f32.mrb[25].mxu0  ;;  %v1012_v12 = vpop.f32.mrb[25].mxu1  ;;  %v1019_v24 = vadd.f32 %v1256_v22, %v1010_v9 }
 0x70f   :  { %v1018_v13 = vadd.f32 %v1255_v7, %v971_v11  ;;  %v973_v14 = vpop.f32.mrb[26].mxu0  ;;  %v1014_v15 = vpop.f32.mrb[26].mxu1  ;;  %v1020_v21 = vadd.f32 %v1257_v20, %v1012_v12 }
 0x710   :  { %v1258_v16 = vmul.f32 -1.442695, %v1017_v10  ;;  %v974_v17 = vpop.f32.mrb[27].mxu0  ;;  %v1015_v18 = vpop.f32.mrb[27].mxu1 }
 0x711   :  { %v1259_v19 = vmul.f32 -1.442695, %v1018_v13  ;;  %v1260_v23 = vmul.f32 -1.442695, %v1020_v21 }
 0x712   :  { %1415 = vpow2.f32 %v1258_v16 }
 0x713   :  { %1417 = vpow2.f32 %v1259_v19 }
 0x714   :  { %1419 = vpow2.f32 %v1260_v23 }
 0x715   :  { %1421 = vtanh.f32 %v1019_v24 }
 0x71c   :  { %v1416_v25 = vpop.eup %1415 }
 0x71d   :  { %v1418_v26 = vpop.eup %1417  ;;  %v1024_v27 = vadd.f32 1.0, %v1416_v25 }
 0x71e   :  { %v1030_v28 = vadd.f32 1.0, %v1418_v26  ;;  %v1420_v29 = vpop.eup %1419 }
 0x71f   :  { %1423 = vrcp.f32 %v1024_v27  ;;  %v1422_v31 = vpop.eup %1421  ;;  %v1037_v55 = vadd.f32 1.0, %v1420_v29 }
 0x720   :  { %1425 = vrcp.f32 %v1030_v28 }
 0x721   :  { %1427 = vrcp.f32 %v1037_v55 }
 0x729   :  { %v1424_v32 = vpop.eup %1423 }
 0x72a   :  { %v1426_v34 = vpop.eup %1425  ;;  %v1041_v40 = vmul.f32 %v1424_v32, %v1422_v31 }
 0x72b   :  { %v1040_v57 = vmul.f32 %v1426_v34, %v2032_v56  ;;  %v1428_v59 = vpop.eup %1427  ;;  %v1263_v56 = vld [vmem:[%s2169_s0 + $0xe8] sm:$0xff] }
 0x72d   :  { %v1042_v58 = vadd.f32 %v1041_v40, %v1040_v57 }
 0x72f   :  { %1429 = vtanh.f32 %v1042_v58 }
 0x739   :  { %v1430_v60 = vpop.eup %1429 }
 0x73a   :  { %v1044_v61 = vmul.f32 %v1430_v60, %v1428_v59 }
 0x73c   :  { %1261 = vst [vmem:[%s2171_s4 + $0x30] sm:$0xff] %v1044_v61  ;;  %v1052_v62 = vpack.c.bf16 %v1044_v61, %v1044_v61 }
 0x73e   :  { %1086 = vmatmul.mubr.bf16.vlgmr.msra.gmra.mrb[28].mxu0 %v1052_v62  ;;  %1127 = vmatmul.mubr.bf16.vlgmr.msra.gmra.mrb[28].mxu1 %v1052_v62 }
 0x811   :  { %v1087_v63 = vpop.f32.mrb[28].mxu0  ;;  %v1128_v6 = vpop.f32.mrb[28].mxu1 }
 0x812   :  { %v1135_v30 = vadd.f32 %v1262_v0, %v1087_v63  ;;  %v1089_v33 = vpop.f32.mrb[29].mxu0  ;;  %v1130_v36 = vpop.f32.mrb[29].mxu1  ;;  %v1137_v48 = vadd.f32 %v1264_v46, %v1128_v6 }
 0x813   :  { %v1136_v1 = vadd.f32 %v1263_v56, %v1089_v33  ;;  %v1091_v37 = vpop.f32.mrb[30].mxu0  ;;  %v1132_v38 = vpop.f32.mrb[30].mxu1  ;;  %v1138_v45 = vadd.f32 %v1265_v44, %v1130_v36 }
 0x814   :  { %v1266_v39 = vmul.f32 -1.442695, %v1135_v30  ;;  %v1092_v41 = vpop.f32.mrb[31].mxu0  ;;  %v1133_v42 = vpop.f32.mrb[31].mxu1 }
 0x815   :  { %v1267_v43 = vmul.f32 -1.442695, %v1136_v1  ;;  %v1268_v47 = vmul.f32 -1.442695, %v1138_v45 }
 0x816   :  { %1431 = vpow2.f32 %v1266_v39 }
 0x817   :  { %1433 = vpow2.f32 %v1267_v43 }
 0x818   :  { %1435 = vpow2.f32 %v1268_v47 }
 0x819   :  { %1437 = vtanh.f32 %v1137_v48 }
 0x820   :  { %v1432_v49 = vpop.eup %1431 }
 0x821   :  { %v1434_v50 = vpop.eup %1433  ;;  %v1142_v51 = vadd.f32 1.0, %v1432_v49 }
 0x822   :  { %v1148_v52 = vadd.f32 1.0, %v1434_v50  ;;  %v1436_v35 = vpop.eup %1435 }
 0x823   :  { %1439 = vrcp.f32 %v1142_v51  ;;  %v1438_v53 = vpop.eup %1437  ;;  %v1155_v4 = vadd.f32 1.0, %v1436_v35 }
 0x824   :  { %1441 = vrcp.f32 %v1148_v52 }
 0x825   :  { %1443 = vrcp.f32 %v1155_v4 }
 0x82d   :  { %v1440_v54 = vpop.eup %1439 }
 0x82e   :  { %v1442_v2 = vpop.eup %1441  ;;  %v1159_v3 = vmul.f32 %v1440_v54, %v1438_v53 }
 0x82f   :  { %v1158_v5 = vmul.f32 %v1442_v2, %v1042_v58  ;;  %v1444_v8 = vpop.eup %1443 }
 0x831   :  { %v1160_v7 = vadd.f32 %v1159_v3, %v1158_v5 }
 0x833   :  { %1445 = vtanh.f32 %v1160_v7  ;;  %1166 = vst [vmem:[%s2172_s6] sm:$0xff] %v1160_v7 }
 0x83d   :  { %v1446_v9 = vpop.eup %1445 }
 0x83e   :  { %v1162_v10 = vmul.f32 %v1446_v9, %v1444_v8 }
 0x840   :  { %1269 = vst [vmem:[%s2171_s4 + $0x38] sm:$0xff] %v1162_v10  ;;  %1165 = vst [vmem:[%s2173_s5] sm:$0xff] %v1162_v10 }

</bundles_post_ra>
